<compile_context>
chip_gen: v7x
topology: tpu7x:2x2x1
jax: 0.10.0
libtpu: 0.0.40
codegen_flags: <defaults>
</compile_context>

<pallas_src>
import functools

import jax
import jax.numpy as jnp
from jax.experimental import pallas as pl
from jax.experimental.pallas import tpu as pltpu

LANES = 128                       # cells per row (TPU lane width)
NSPLIT = 2                        # leading "parallel" axis (2 TCs on v7x; ~free elsewhere)
VMEM_BUDGET = 12 * 1024 * 1024    # budget for double-buffered pred+target blocks
TS_CAP = 256                      # tile-row cap so blocks also fit v7x's smaller VMEM


def _round_up(x, m):
    return (x + m - 1) // m * m


def _yolo_loss_kernel(pred_ref, tgt_ref, anc_ref, out_ref, *, ts, n_classes):
    # pred_ref: (1, 5+C, ts, 128) VMEM block   (anchor, channel, row, lane)
    # tgt_ref : (1, 6,   ts, 128) VMEM block
    # anc_ref : (A, 2)            SMEM (whole array)
    # out_ref : (1, 6, 8, 128)    VMEM partial sums for this split:
    #           [noobj_bce, noobj_cnt, obj_mse, obj_cnt, box_mse, ce]
    a = pl.program_id(1)
    t = pl.program_id(2)

    # First step of this split: zero this split's resident output block.
    @pl.when(jnp.logical_and(a == 0, t == 0))
    def _():
        out_ref[...] = jnp.zeros_like(out_ref)

    anc_w = anc_ref[a, 0]          # scalar f32 (one anchor per block)
    anc_h = anc_ref[a, 1]
    inv_anc_w = 1.0 / anc_w        # scalar recip, once per grid step
    inv_anc_h = 1.0 / anc_h

    pv = pred_ref.at[0]            # (5+C, ts, 128) ref view
    tv = tgt_ref.at[0]             # (6,   ts, 128) ref view

    n_chunks = ts // 8

    def chunk(k, carry):
        acc_bce, acc_ncnt, acc_obj, acc_ocnt, acc_box, acc_ce = carry
        r0 = pl.multiple_of(k * 8, 8)
        sl = pl.ds(r0, 8)

        t0 = tv[0, sl, :]                         # (8, 128)
        obj = t0 == 1.0
        noobj = t0 == 0.0                         # padded cells carry -1 -> neither mask

        # ---- no-object loss: BCE-with-logits on pred[..., 0]; t0 == 0 on the
        # accumulated cells, so the -p0*t0 term is dropped. ----
        p0 = pv[0, sl, :]
        e = jnp.exp(-jnp.abs(p0))                 # shared exp for softplus + sigmoid
        bce = jnp.maximum(p0, 0.0) + jnp.log(1.0 + e)
        inv_1pe = 1.0 / (1.0 + e)
        sig_p0 = jnp.where(p0 >= 0.0, inv_1pe, e * inv_1pe)   # stable sigmoid(p0)

        # ---- decoded box predictions ----
        px = jax.nn.sigmoid(pv[1, sl, :])
        py = jax.nn.sigmoid(pv[2, sl, :])
        p3 = pv[3, sl, :]
        p4 = pv[4, sl, :]
        pw = jnp.exp(p3) * anc_w
        ph = jnp.exp(p4) * anc_h

        tx = tv[1, sl, :]
        ty = tv[2, sl, :]
        tw = tv[3, sl, :]
        th = tv[4, sl, :]

        # ---- IoU (center-format boxes). NOTE: reference detaches the IoU;
        # forward value is identical. TODO(synk): add a custom VJP stopping
        # this grad if the kernel is ever differentiated. ----
        hw, hh = pw * 0.5, ph * 0.5
        thw, thh = tw * 0.5, th * 0.5
        ix = jnp.maximum(jnp.minimum(px + hw, tx + thw)
                         - jnp.maximum(px - hw, tx - thw), 0.0)
        iy = jnp.maximum(jnp.minimum(py + hh, ty + thh)
                         - jnp.maximum(py - hh, ty - thh), 0.0)
        inter = ix * iy
        area1 = pw * ph                            # == |(b1x2-b1x1)(b1y2-b1y1)|
        area2 = jnp.abs(tw * th)
        ious = inter / (area1 + area2 - inter + 1e-6)

        # ---- object loss: (sigmoid(p0) - iou * t0)^2, t0 == 1 on obj cells ----
        obj_sq = (sig_p0 - ious) ** 2

        # ---- box loss: [sigmoid(x), sigmoid(y), w, h] vs transformed target ----
        tw_log = jnp.log(1e-6 + tw * inv_anc_w)
        th_log = jnp.log(1e-6 + th * inv_anc_h)
        dx = px - tx
        dy = py - ty
        dw = p3 - tw_log
        dh = p4 - th_log
        box_sq = dx * dx + dy * dy + dw * dw + dh * dh

        # ---- class cross-entropy: two passes over channels, scalar compares
        # (no iota, O(1) live vregs regardless of C) ----
        cls_f = tv[5, sl, :]                       # class ids as exact floats
        l0 = pv[5, sl, :]
        m = l0
        picked = jnp.where(cls_f == 0.0, l0, 0.0)
        for c in range(1, n_classes):
            lc = pv[5 + c, sl, :]
            m = jnp.maximum(m, lc)
            picked = picked + jnp.where(cls_f == float(c), lc, 0.0)
        ssum = jnp.zeros_like(m)
        for c in range(n_classes):
            ssum = ssum + jnp.exp(pv[5 + c, sl, :] - m)
        ce = m + jnp.log(ssum) - picked

        return (acc_bce + jnp.where(noobj, bce, 0.0),
                acc_ncnt + noobj.astype(jnp.float32),
                acc_obj + jnp.where(obj, obj_sq, 0.0),
                acc_ocnt + obj.astype(jnp.float32),
                acc_box + jnp.where(obj, box_sq, 0.0),
                acc_ce + jnp.where(obj, ce, 0.0))

    init = tuple(jnp.zeros((8, LANES), jnp.float32) for _ in range(6))
    if n_chunks == 1:
        accs = chunk(0, init)
    else:
        accs = jax.lax.fori_loop(0, n_chunks, chunk, init, unroll=(n_chunks <= 8))

    # One read-modify-write of the resident output block per grid step.
    for i in range(6):
        out_ref[0, i] += accs[i]


@jax.jit
def yolo_loss_pallas(pred, target, anchors):
    """pred: (B, A, S, S, 5+C) f32; target: (B, A, S, S, 6) f32; anchors: (A, 2) f32."""
    B, A, S1, S2, D = pred.shape
    C = D - 5
    M = B * S1 * S2                      # cells per anchor

    # Per-anchor, channels-first layout (A, D, M).
    # TODO(synk): this transpose is a full HBM round-trip of pred/target and
    # dominates on memory-bound v5e/v6e; ideally the producing layer emits the
    # channels-first (A, D, cells) layout (bf16) directly.
    pred_f = jnp.transpose(pred, (1, 4, 0, 2, 3)).reshape(A, D, M).astype(jnp.float32)
    tgt_f = jnp.transpose(target, (1, 4, 0, 2, 3)).reshape(A, 6, M).astype(jnp.float32)

    rows = pl.cdiv(M, LANES)

    # Tile rows from the VMEM budget (double-buffered pred+target blocks),
    # multiple of 8, capped so blocks also fit v7x's smaller VMEM.
    ts_budget = VMEM_BUDGET // (2 * (D + 6) * LANES * 4)
    ts_budget = max(8, (ts_budget // 8) * 8)
    rows_per_split = _round_up(pl.cdiv(rows, NSPLIT), 8)
    ts = max(8, min(TS_CAP, ts_budget, rows_per_split))

    rows_pad = _round_up(rows, NSPLIT * ts)
    tiles_per_split = rows_pad // (NSPLIT * ts)
    m_pad = rows_pad * LANES
    if m_pad != M:
        pad = m_pad - M
        pred_f = jnp.pad(pred_f, ((0, 0), (0, 0), (0, pad)))
        tgt_f = jnp.pad(tgt_f, ((0, 0), (0, 0), (0, pad)))
        # padded cells are neither obj (==1) nor no-obj (==0)
        tgt_f = tgt_f.at[:, 0, M:].set(-1.0)
    pred_f = pred_f.reshape(A, D, rows_pad, LANES)
    tgt_f = tgt_f.reshape(A, 6, rows_pad, LANES)
    anc_f = anchors.astype(jnp.float32)          # (A, 2) -> SMEM

    grid = (NSPLIT, A, tiles_per_split)

    def row_block(s, a, t):
        return (a, 0, s * tiles_per_split + t, 0)

    partial = pl.pallas_call(
        functools.partial(_yolo_loss_kernel, ts=ts, n_classes=C),
        out_shape=jax.ShapeDtypeStruct((NSPLIT, 6, 8, LANES), jnp.float32),
        grid_spec=pltpu.PrefetchScalarGridSpec(
            num_scalar_prefetch=0,
            grid=grid,
            in_specs=[
                pl.BlockSpec((1, D, ts, LANES), row_block),
                pl.BlockSpec((1, 6, ts, LANES), row_block),
                pl.BlockSpec(memory_space=pltpu.MemorySpace.SMEM),
            ],
            out_specs=pl.BlockSpec((1, 6, 8, LANES), lambda s, a, t: (s, 0, 0, 0)),
        ),
        compiler_params=pltpu.CompilerParams(
            dimension_semantics=("parallel", "arbitrary", "arbitrary"),
            vmem_limit_bytes=32 * 1024 * 1024,
        ),
    )(pred_f, tgt_f, anc_f)

    sums = jnp.sum(partial, axis=(0, 2, 3))      # (6,) scalar partial sums

    # Masked means with dynamic counts (matches PyTorch; NaN/Inf if a mask is
    # empty, exactly like the reference).
    no_object_loss = sums[0] / sums[1]
    object_loss = sums[2] / sums[3]
    box_loss = sums[4] / (4.0 * sums[3])
    class_loss = sums[5] / sums[3]
    return box_loss + object_loss + no_object_loss + class_loss


def yolo_loss_ref(pred, target, anchors):
    """Pure-JAX reference mirroring the PyTorch forward exactly (masked means)."""
    obj = target[..., 0] == 1.0
    noobj = target[..., 0] == 0.0
    p0 = pred[..., 0]
    t0 = target[..., 0]

    bce = jnp.maximum(p0, 0.0) - p0 * t0 + jnp.log(1.0 + jnp.exp(-jnp.abs(p0)))
    no_object_loss = jnp.sum(jnp.where(noobj, bce, 0.0)) / jnp.sum(noobj)

    anc = anchors.reshape(1, 3, 1, 1, 2)
    bx = jax.nn.sigmoid(pred[..., 1])
    by = jax.nn.sigmoid(pred[..., 2])
    bw = jnp.exp(pred[..., 3]) * anc[..., 0]
    bh = jnp.exp(pred[..., 4]) * anc[..., 1]
    tx, ty, tw, th = (target[..., 1], target[..., 2], target[..., 3], target[..., 4])

    b1x1, b1x2 = bx - bw / 2, bx + bw / 2
    b1y1, b1y2 = by - bh / 2, by + bh / 2
    b2x1, b2x2 = tx - tw / 2, tx + tw / 2
    b2y1, b2y2 = ty - th / 2, ty + th / 2
    inter = (jnp.maximum(jnp.minimum(b1x2, b2x2) - jnp.maximum(b1x1, b2x1), 0.0)
             * jnp.maximum(jnp.minimum(b1y2, b2y2) - jnp.maximum(b1y1, b2y1), 0.0))
    a1 = jnp.abs((b1x2 - b1x1) * (b1y2 - b1y1))
    a2 = jnp.abs((b2x2 - b2x1) * (b2y2 - b2y1))
    ious = inter / (a1 + a2 - inter + 1e-6)

    object_loss = (jnp.sum(jnp.where(obj, (jax.nn.sigmoid(p0) - ious * t0) ** 2, 0.0))
                   / jnp.sum(obj))

    tw_log = jnp.log(1e-6 + tw / anc[..., 0])
    th_log = jnp.log(1e-6 + th / anc[..., 1])
    box_sq = ((bx - tx) ** 2 + (by - ty) ** 2
              + (pred[..., 3] - tw_log) ** 2 + (pred[..., 4] - th_log) ** 2)
    box_loss = jnp.sum(jnp.where(obj, box_sq, 0.0)) / (4.0 * jnp.sum(obj))

    logits = pred[..., 5:]
    lse = jax.scipy.special.logsumexp(logits, axis=-1)
    cls = target[..., 5].astype(jnp.int32)
    picked = jnp.take_along_axis(logits, cls[..., None], axis=-1)[..., 0]
    class_loss = jnp.sum(jnp.where(obj, lse - picked, 0.0)) / jnp.sum(obj)

    return box_loss + object_loss + no_object_loss + class_loss


if __name__ == "__main__":
    key = jax.random.PRNGKey(0)
    B, A, S, C = 2, 3, 31, 8          # S=31 exercises padding + the 2-way split
    D = 5 + C

    k1, k2, k3, k4, k5 = jax.random.split(key, 5)
    pred = jax.random.normal(k1, (B, A, S, S, D), dtype=jnp.float32)

    # target: [obj_flag, x, y, w, h, class_id]
    flag = (jax.random.uniform(k2, (B, A, S, S)) < 0.3).astype(jnp.float32)
    flag = flag.at[0, 0, 0, 0].set(1.0)   # ensure at least one obj cell
    flag = flag.at[0, 0, 0, 1].set(0.0)   # ensure at least one no-obj cell
    xy = jax.random.uniform(k3, (B, A, S, S, 2), minval=0.05, maxval=0.95)
    wh = jax.random.uniform(k4, (B, A, S, S, 2), minval=0.5, maxval=3.0)
    cls = jax.random.randint(k5, (B, A, S, S), 0, C).astype(jnp.float32)
    target = jnp.concatenate([flag[..., None], xy, wh, cls[..., None]], axis=-1)

    anchors = jnp.array([[1.0, 1.5], [2.0, 2.5], [3.0, 1.0]], dtype=jnp.float32)

    loss = yolo_loss_pallas(pred, target, anchors)
    jax.block_until_ready(loss)

    loss_ref = yolo_loss_ref(pred, target, anchors)
    assert jnp.allclose(loss, loss_ref, rtol=1e-4, atol=1e-4), (loss, loss_ref)

    print("KERNEL_OK")
</pallas_src>

<mosaic_0001>
module attributes {stable_mosaic.version = 11 : i64} {
  func.func @_yolo_loss_kernel(%arg0: i32, %arg1: i32, %arg2: i32, %arg3: memref<1x13x8x128xf32, #tpu.memory_space<vmem>>, %arg4: memref<1x6x8x128xf32, #tpu.memory_space<vmem>>, %arg5: memref<3x2xf32, #tpu.memory_space<smem>>, %arg6: memref<1x6x8x128xf32, #tpu.memory_space<vmem>>) attributes {dimension_semantics = [#tpu.dimension_semantics<parallel>, #tpu.dimension_semantics<arbitrary>, #tpu.dimension_semantics<arbitrary>], iteration_bounds = array<i64: 2, 3, 1>, scalar_prefetch = 0 : i64, scratch_operands = 0 : i64, tpu.core_type = #tpu.core_type<tc>, window_params = [{transform_indices = @transform_0, window_bounds = array<i64: 1, 13, 8, 128>}, {transform_indices = @transform_1, window_bounds = array<i64: 1, 6, 8, 128>}, {transform_indices = @transform_2, window_bounds = array<i64: 3, 2>}, {transform_indices = @transform_3, window_bounds = array<i64: 1, 6, 8, 128>}]} {
    %c0_i32 = arith.constant 0 : i32
    %0 = arith.cmpi eq, %arg1, %c0_i32 : i32
    %c0_i32_0 = arith.constant 0 : i32
    %1 = arith.cmpi eq, %arg2, %c0_i32_0 : i32
    %2 = arith.andi %0, %1 : i1
    %3 = arith.extui %2 : i1 to i32
    %c0_i32_1 = arith.constant 0 : i32
    %4 = arith.cmpi ne, %3, %c0_i32_1 : i32
    scf.if %4 {
      %cst_249 = arith.constant 0.000000e+00 : f32
      %377 = vector.broadcast %cst_249 : f32 to vector<1x6x8x128xf32>
      %c0_250 = arith.constant 0 : index
      %c0_251 = arith.constant 0 : index
      %c0_252 = arith.constant 0 : index
      %c0_253 = arith.constant 0 : index
      %378 = vector.load %arg6[%c0_250, %c0_251, %c0_252, %c0_253] : memref<1x6x8x128xf32, #tpu.memory_space<vmem>>, vector<1x6x8x128xf32>
      tpu.vector_store %arg6[%c0_250, %c0_251, %c0_252, %c0_253], %377 {strides = array<i32>} : memref<1x6x8x128xf32, #tpu.memory_space<vmem>>, vector<1x6x8x128xf32>,
    } else {
    }
    %5 = arith.index_cast %arg1 : i32 to index
    %c0 = arith.constant 0 : index
    %6 = memref.load %arg5[%5, %c0] : memref<3x2xf32, #tpu.memory_space<smem>>
    %7 = arith.index_cast %arg1 : i32 to index
    %c1 = arith.constant 1 : index
    %8 = memref.load %arg5[%7, %c1] : memref<3x2xf32, #tpu.memory_space<smem>>
    %cst = arith.constant 1.000000e+00 : f32
    %9 = arith.divf %cst, %6 : f32
    %cst_2 = arith.constant 1.000000e+00 : f32
    %10 = arith.divf %cst_2, %8 : f32
    %cst_3 = arith.constant 0.000000e+00 : f32
    %11 = vector.broadcast %cst_3 : f32 to vector<8x128xf32>
    %cst_4 = arith.constant 0.000000e+00 : f32
    %12 = vector.broadcast %cst_4 : f32 to vector<8x128xf32>
    %cst_5 = arith.constant 0.000000e+00 : f32
    %13 = vector.broadcast %cst_5 : f32 to vector<8x128xf32>
    %cst_6 = arith.constant 0.000000e+00 : f32
    %14 = vector.broadcast %cst_6 : f32 to vector<8x128xf32>
    %cst_7 = arith.constant 0.000000e+00 : f32
    %15 = vector.broadcast %cst_7 : f32 to vector<8x128xf32>
    %cst_8 = arith.constant 0.000000e+00 : f32
    %16 = vector.broadcast %cst_8 : f32 to vector<8x128xf32>
    %c0_i32_9 = arith.constant 0 : i32
    %17 = tpu.assume_multiple %c0_i32_9, 8 : i32
    %c0_i32_10 = arith.constant 0 : i32
    %c0_i32_11 = arith.constant 0 : i32
    %c0_i32_12 = arith.constant 0 : i32
    %c0_i32_13 = arith.constant 0 : i32
    %18 = tpu.memref_slice %arg4[%c0_i32_10, %c0_i32_11, %c0_i32_12, %c0_i32_13] : memref<1x6x8x128xf32, #tpu.memory_space<vmem>> -> memref<1x6x8x128xf32, #tpu.memory_space<vmem>>
    %19 = tpu.memref_squeeze %18 : memref<1x6x8x128xf32, #tpu.memory_space<vmem>> -> memref<6x8x128xf32, #tpu.memory_space<vmem>>
    %c0_14 = arith.constant 0 : index
    %20 = arith.index_cast %17 : i32 to index
    %c0_15 = arith.constant 0 : index
    %21 = vector.load %19[%c0_14, %20, %c0_15] : memref<6x8x128xf32, #tpu.memory_space<vmem>>, vector<1x8x128xf32>
    %22 = vector.shape_cast %21 : vector<1x8x128xf32> to vector<8x128xf32>
    %cst_16 = arith.constant 1.000000e+00 : f32
    %23 = vector.broadcast %cst_16 : f32 to vector<8x128xf32>
    %24 = arith.cmpf oeq, %22, %23 : vector<8x128xf32>
    %cst_17 = arith.constant 0.000000e+00 : f32
    %25 = vector.broadcast %cst_17 : f32 to vector<8x128xf32>
    %26 = arith.cmpf oeq, %22, %25 : vector<8x128xf32>
    %c0_i32_18 = arith.constant 0 : i32
    %c0_i32_19 = arith.constant 0 : i32
    %c0_i32_20 = arith.constant 0 : i32
    %c0_i32_21 = arith.constant 0 : i32
    %27 = tpu.memref_slice %arg3[%c0_i32_18, %c0_i32_19, %c0_i32_20, %c0_i32_21] : memref<1x13x8x128xf32, #tpu.memory_space<vmem>> -> memref<1x13x8x128xf32, #tpu.memory_space<vmem>>
    %28 = tpu.memref_squeeze %27 : memref<1x13x8x128xf32, #tpu.memory_space<vmem>> -> memref<13x8x128xf32, #tpu.memory_space<vmem>>
    %c0_22 = arith.constant 0 : index
    %29 = arith.index_cast %17 : i32 to index
    %c0_23 = arith.constant 0 : index
    %30 = vector.load %28[%c0_22, %29, %c0_23] : memref<13x8x128xf32, #tpu.memory_space<vmem>>, vector<1x8x128xf32>
    %31 = vector.shape_cast %30 : vector<1x8x128xf32> to vector<8x128xf32>
    %32 = math.absf %31 : vector<8x128xf32>
    %cst_24 = arith.constant 0.000000e+00 : f32
    %33 = vector.broadcast %cst_24 : f32 to vector<8x128xf32>
    %34 = arith.subf %33, %32 : vector<8x128xf32>
    %35 = math.exp %34 : vector<8x128xf32>
    %cst_25 = arith.constant 0.000000e+00 : f32
    %36 = vector.broadcast %cst_25 : f32 to vector<8x128xf32>
    %37 = arith.maximumf %31, %36 : vector<8x128xf32>
    %cst_26 = arith.constant 1.000000e+00 : f32
    %38 = vector.broadcast %cst_26 : f32 to vector<8x128xf32>
    %39 = arith.addf %38, %35 : vector<8x128xf32>
    %40 = math.log %39 : vector<8x128xf32>
    %41 = arith.addf %37, %40 : vector<8x128xf32>
    %cst_27 = arith.constant 1.000000e+00 : f32
    %42 = vector.broadcast %cst_27 : f32 to vector<8x128xf32>
    %43 = arith.addf %42, %35 : vector<8x128xf32>
    %cst_28 = arith.constant 1.000000e+00 : f32
    %44 = vector.broadcast %cst_28 : f32 to vector<8x128xf32>
    %45 = arith.divf %44, %43 : vector<8x128xf32>
    %cst_29 = arith.constant 0.000000e+00 : f32
    %46 = vector.broadcast %cst_29 : f32 to vector<8x128xf32>
    %47 = arith.cmpf oge, %31, %46 : vector<8x128xf32>
    %48 = arith.mulf %35, %45 : vector<8x128xf32>
    %49 = arith.select %47, %45, %48 : vector<8x128xi1>, vector<8x128xf32>
    %c0_i32_30 = arith.constant 0 : i32
    %c0_i32_31 = arith.constant 0 : i32
    %c0_i32_32 = arith.constant 0 : i32
    %c0_i32_33 = arith.constant 0 : i32
    %50 = tpu.memref_slice %arg3[%c0_i32_30, %c0_i32_31, %c0_i32_32, %c0_i32_33] : memref<1x13x8x128xf32, #tpu.memory_space<vmem>> -> memref<1x13x8x128xf32, #tpu.memory_space<vmem>>
    %51 = tpu.memref_squeeze %50 : memref<1x13x8x128xf32, #tpu.memory_space<vmem>> -> memref<13x8x128xf32, #tpu.memory_space<vmem>>
    %c1_34 = arith.constant 1 : index
    %52 = arith.index_cast %17 : i32 to index
    %c0_35 = arith.constant 0 : index
    %53 = vector.load %51[%c1_34, %52, %c0_35] : memref<13x8x128xf32, #tpu.memory_space<vmem>>, vector<1x8x128xf32>
    %54 = vector.shape_cast %53 : vector<1x8x128xf32> to vector<8x128xf32>
    %55 = arith.negf %54 : vector<8x128xf32>
    %56 = math.exp %55 : vector<8x128xf32>
    %cst_36 = arith.constant 1.000000e+00 : f32
    %57 = vector.broadcast %cst_36 : f32 to vector<8x128xf32>
    %58 = arith.addf %57, %56 : vector<8x128xf32>
    %59 = arith.divf %57, %58 : vector<8x128xf32>
    %c0_i32_37 = arith.constant 0 : i32
    %c0_i32_38 = arith.constant 0 : i32
    %c0_i32_39 = arith.constant 0 : i32
    %c0_i32_40 = arith.constant 0 : i32
    %60 = tpu.memref_slice %arg3[%c0_i32_37, %c0_i32_38, %c0_i32_39, %c0_i32_40] : memref<1x13x8x128xf32, #tpu.memory_space<vmem>> -> memref<1x13x8x128xf32, #tpu.memory_space<vmem>>
    %61 = tpu.memref_squeeze %60 : memref<1x13x8x128xf32, #tpu.memory_space<vmem>> -> memref<13x8x128xf32, #tpu.memory_space<vmem>>
    %c2 = arith.constant 2 : index
    %62 = arith.index_cast %17 : i32 to index
    %c0_41 = arith.constant 0 : index
    %63 = vector.load %61[%c2, %62, %c0_41] : memref<13x8x128xf32, #tpu.memory_space<vmem>>, vector<1x8x128xf32>
    %64 = vector.shape_cast %63 : vector<1x8x128xf32> to vector<8x128xf32>
    %65 = arith.negf %64 : vector<8x128xf32>
    %66 = math.exp %65 : vector<8x128xf32>
    %cst_42 = arith.constant 1.000000e+00 : f32
    %67 = vector.broadcast %cst_42 : f32 to vector<8x128xf32>
    %68 = arith.addf %67, %66 : vector<8x128xf32>
    %69 = arith.divf %67, %68 : vector<8x128xf32>
    %c0_i32_43 = arith.constant 0 : i32
    %c0_i32_44 = arith.constant 0 : i32
    %c0_i32_45 = arith.constant 0 : i32
    %c0_i32_46 = arith.constant 0 : i32
    %70 = tpu.memref_slice %arg3[%c0_i32_43, %c0_i32_44, %c0_i32_45, %c0_i32_46] : memref<1x13x8x128xf32, #tpu.memory_space<vmem>> -> memref<1x13x8x128xf32, #tpu.memory_space<vmem>>
    %71 = tpu.memref_squeeze %70 : memref<1x13x8x128xf32, #tpu.memory_space<vmem>> -> memref<13x8x128xf32, #tpu.memory_space<vmem>>
    %c3 = arith.constant 3 : index
    %72 = arith.index_cast %17 : i32 to index
    %c0_47 = arith.constant 0 : index
    %73 = vector.load %71[%c3, %72, %c0_47] : memref<13x8x128xf32, #tpu.memory_space<vmem>>, vector<1x8x128xf32>
    %74 = vector.shape_cast %73 : vector<1x8x128xf32> to vector<8x128xf32>
    %c0_i32_48 = arith.constant 0 : i32
    %c0_i32_49 = arith.constant 0 : i32
    %c0_i32_50 = arith.constant 0 : i32
    %c0_i32_51 = arith.constant 0 : i32
    %75 = tpu.memref_slice %arg3[%c0_i32_48, %c0_i32_49, %c0_i32_50, %c0_i32_51] : memref<1x13x8x128xf32, #tpu.memory_space<vmem>> -> memref<1x13x8x128xf32, #tpu.memory_space<vmem>>
    %76 = tpu.memref_squeeze %75 : memref<1x13x8x128xf32, #tpu.memory_space<vmem>> -> memref<13x8x128xf32, #tpu.memory_space<vmem>>
    %c4 = arith.constant 4 : index
    %77 = arith.index_cast %17 : i32 to index
    %c0_52 = arith.constant 0 : index
    %78 = vector.load %76[%c4, %77, %c0_52] : memref<13x8x128xf32, #tpu.memory_space<vmem>>, vector<1x8x128xf32>
    %79 = vector.shape_cast %78 : vector<1x8x128xf32> to vector<8x128xf32>
    %80 = math.exp %74 : vector<8x128xf32>
    %81 = vector.broadcast %6 : f32 to vector<8x128xf32>
    %82 = arith.mulf %80, %81 : vector<8x128xf32>
    %83 = math.exp %79 : vector<8x128xf32>
    %84 = vector.broadcast %8 : f32 to vector<8x128xf32>
    %85 = arith.mulf %83, %84 : vector<8x128xf32>
    %c0_i32_53 = arith.constant 0 : i32
    %c0_i32_54 = arith.constant 0 : i32
    %c0_i32_55 = arith.constant 0 : i32
    %c0_i32_56 = arith.constant 0 : i32
    %86 = tpu.memref_slice %arg4[%c0_i32_53, %c0_i32_54, %c0_i32_55, %c0_i32_56] : memref<1x6x8x128xf32, #tpu.memory_space<vmem>> -> memref<1x6x8x128xf32, #tpu.memory_space<vmem>>
    %87 = tpu.memref_squeeze %86 : memref<1x6x8x128xf32, #tpu.memory_space<vmem>> -> memref<6x8x128xf32, #tpu.memory_space<vmem>>
    %c1_57 = arith.constant 1 : index
    %88 = arith.index_cast %17 : i32 to index
    %c0_58 = arith.constant 0 : index
    %89 = vector.load %87[%c1_57, %88, %c0_58] : memref<6x8x128xf32, #tpu.memory_space<vmem>>, vector<1x8x128xf32>
    %90 = vector.shape_cast %89 : vector<1x8x128xf32> to vector<8x128xf32>
    %c0_i32_59 = arith.constant 0 : i32
    %c0_i32_60 = arith.constant 0 : i32
    %c0_i32_61 = arith.constant 0 : i32
    %c0_i32_62 = arith.constant 0 : i32
    %91 = tpu.memref_slice %arg4[%c0_i32_59, %c0_i32_60, %c0_i32_61, %c0_i32_62] : memref<1x6x8x128xf32, #tpu.memory_space<vmem>> -> memref<1x6x8x128xf32, #tpu.memory_space<vmem>>
    %92 = tpu.memref_squeeze %91 : memref<1x6x8x128xf32, #tpu.memory_space<vmem>> -> memref<6x8x128xf32, #tpu.memory_space<vmem>>
    %c2_63 = arith.constant 2 : index
    %93 = arith.index_cast %17 : i32 to index
    %c0_64 = arith.constant 0 : index
    %94 = vector.load %92[%c2_63, %93, %c0_64] : memref<6x8x128xf32, #tpu.memory_space<vmem>>, vector<1x8x128xf32>
    %95 = vector.shape_cast %94 : vector<1x8x128xf32> to vector<8x128xf32>
    %c0_i32_65 = arith.constant 0 : i32
    %c0_i32_66 = arith.constant 0 : i32
    %c0_i32_67 = arith.constant 0 : i32
    %c0_i32_68 = arith.constant 0 : i32
    %96 = tpu.memref_slice %arg4[%c0_i32_65, %c0_i32_66, %c0_i32_67, %c0_i32_68] : memref<1x6x8x128xf32, #tpu.memory_space<vmem>> -> memref<1x6x8x128xf32, #tpu.memory_space<vmem>>
    %97 = tpu.memref_squeeze %96 : memref<1x6x8x128xf32, #tpu.memory_space<vmem>> -> memref<6x8x128xf32, #tpu.memory_space<vmem>>
    %c3_69 = arith.constant 3 : index
    %98 = arith.index_cast %17 : i32 to index
    %c0_70 = arith.constant 0 : index
    %99 = vector.load %97[%c3_69, %98, %c0_70] : memref<6x8x128xf32, #tpu.memory_space<vmem>>, vector<1x8x128xf32>
    %100 = vector.shape_cast %99 : vector<1x8x128xf32> to vector<8x128xf32>
    %c0_i32_71 = arith.constant 0 : i32
    %c0_i32_72 = arith.constant 0 : i32
    %c0_i32_73 = arith.constant 0 : i32
    %c0_i32_74 = arith.constant 0 : i32
    %101 = tpu.memref_slice %arg4[%c0_i32_71, %c0_i32_72, %c0_i32_73, %c0_i32_74] : memref<1x6x8x128xf32, #tpu.memory_space<vmem>> -> memref<1x6x8x128xf32, #tpu.memory_space<vmem>>
    %102 = tpu.memref_squeeze %101 : memref<1x6x8x128xf32, #tpu.memory_space<vmem>> -> memref<6x8x128xf32, #tpu.memory_space<vmem>>
    %c4_75 = arith.constant 4 : index
    %103 = arith.index_cast %17 : i32 to index
    %c0_76 = arith.constant 0 : index
    %104 = vector.load %102[%c4_75, %103, %c0_76] : memref<6x8x128xf32, #tpu.memory_space<vmem>>, vector<1x8x128xf32>
    %105 = vector.shape_cast %104 : vector<1x8x128xf32> to vector<8x128xf32>
    %cst_77 = arith.constant 5.000000e-01 : f32
    %106 = vector.broadcast %cst_77 : f32 to vector<8x128xf32>
    %107 = arith.mulf %82, %106 : vector<8x128xf32>
    %cst_78 = arith.constant 5.000000e-01 : f32
    %108 = vector.broadcast %cst_78 : f32 to vector<8x128xf32>
    %109 = arith.mulf %85, %108 : vector<8x128xf32>
    %cst_79 = arith.constant 5.000000e-01 : f32
    %110 = vector.broadcast %cst_79 : f32 to vector<8x128xf32>
    %111 = arith.mulf %100, %110 : vector<8x128xf32>
    %cst_80 = arith.constant 5.000000e-01 : f32
    %112 = vector.broadcast %cst_80 : f32 to vector<8x128xf32>
    %113 = arith.mulf %105, %112 : vector<8x128xf32>
    %114 = arith.addf %59, %107 : vector<8x128xf32>
    %115 = arith.addf %90, %111 : vector<8x128xf32>
    %116 = arith.minimumf %114, %115 : vector<8x128xf32>
    %117 = arith.subf %59, %107 : vector<8x128xf32>
    %118 = arith.subf %90, %111 : vector<8x128xf32>
    %119 = arith.maximumf %117, %118 : vector<8x128xf32>
    %120 = arith.subf %116, %119 : vector<8x128xf32>
    %cst_81 = arith.constant 0.000000e+00 : f32
    %121 = vector.broadcast %cst_81 : f32 to vector<8x128xf32>
    %122 = arith.maximumf %120, %121 : vector<8x128xf32>
    %123 = arith.addf %69, %109 : vector<8x128xf32>
    %124 = arith.addf %95, %113 : vector<8x128xf32>
    %125 = arith.minimumf %123, %124 : vector<8x128xf32>
    %126 = arith.subf %69, %109 : vector<8x128xf32>
    %127 = arith.subf %95, %113 : vector<8x128xf32>
    %128 = arith.maximumf %126, %127 : vector<8x128xf32>
    %129 = arith.subf %125, %128 : vector<8x128xf32>
    %cst_82 = arith.constant 0.000000e+00 : f32
    %130 = vector.broadcast %cst_82 : f32 to vector<8x128xf32>
    %131 = arith.maximumf %129, %130 : vector<8x128xf32>
    %132 = arith.mulf %122, %131 : vector<8x128xf32>
    %133 = arith.mulf %82, %85 : vector<8x128xf32>
    %134 = arith.mulf %100, %105 : vector<8x128xf32>
    %135 = math.absf %134 : vector<8x128xf32>
    %136 = arith.addf %133, %135 : vector<8x128xf32>
    %137 = arith.subf %136, %132 : vector<8x128xf32>
    %cst_83 = arith.constant 9.99999997E-7 : f32
    %138 = vector.broadcast %cst_83 : f32 to vector<8x128xf32>
    %139 = arith.addf %137, %138 : vector<8x128xf32>
    %140 = arith.divf %132, %139 : vector<8x128xf32>
    %141 = arith.subf %49, %140 : vector<8x128xf32>
    %142 = arith.mulf %141, %141 : vector<8x128xf32>
    %143 = vector.broadcast %9 : f32 to vector<8x128xf32>
    %144 = arith.mulf %100, %143 : vector<8x128xf32>
    %cst_84 = arith.constant 9.99999997E-7 : f32
    %145 = vector.broadcast %cst_84 : f32 to vector<8x128xf32>
    %146 = arith.addf %145, %144 : vector<8x128xf32>
    %147 = math.log %146 : vector<8x128xf32>
    %148 = vector.broadcast %10 : f32 to vector<8x128xf32>
    %149 = arith.mulf %105, %148 : vector<8x128xf32>
    %cst_85 = arith.constant 9.99999997E-7 : f32
    %150 = vector.broadcast %cst_85 : f32 to vector<8x128xf32>
    %151 = arith.addf %150, %149 : vector<8x128xf32>
    %152 = math.log %151 : vector<8x128xf32>
    %153 = arith.subf %59, %90 : vector<8x128xf32>
    %154 = arith.subf %69, %95 : vector<8x128xf32>
    %155 = arith.subf %74, %147 : vector<8x128xf32>
    %156 = arith.subf %79, %152 : vector<8x128xf32>
    %157 = arith.mulf %153, %153 : vector<8x128xf32>
    %158 = arith.mulf %154, %154 : vector<8x128xf32>
    %159 = arith.addf %157, %158 : vector<8x128xf32>
    %160 = arith.mulf %155, %155 : vector<8x128xf32>
    %161 = arith.addf %159, %160 : vector<8x128xf32>
    %162 = arith.mulf %156, %156 : vector<8x128xf32>
    %163 = arith.addf %161, %162 : vector<8x128xf32>
    %c0_i32_86 = arith.constant 0 : i32
    %c0_i32_87 = arith.constant 0 : i32
    %c0_i32_88 = arith.constant 0 : i32
    %c0_i32_89 = arith.constant 0 : i32
    %164 = tpu.memref_slice %arg4[%c0_i32_86, %c0_i32_87, %c0_i32_88, %c0_i32_89] : memref<1x6x8x128xf32, #tpu.memory_space<vmem>> -> memref<1x6x8x128xf32, #tpu.memory_space<vmem>>
    %165 = tpu.memref_squeeze %164 : memref<1x6x8x128xf32, #tpu.memory_space<vmem>> -> memref<6x8x128xf32, #tpu.memory_space<vmem>>
    %c5 = arith.constant 5 : index
    %166 = arith.index_cast %17 : i32 to index
    %c0_90 = arith.constant 0 : index
    %167 = vector.load %165[%c5, %166, %c0_90] : memref<6x8x128xf32, #tpu.memory_space<vmem>>, vector<1x8x128xf32>
    %168 = vector.shape_cast %167 : vector<1x8x128xf32> to vector<8x128xf32>
    %c0_i32_91 = arith.constant 0 : i32
    %c0_i32_92 = arith.constant 0 : i32
    %c0_i32_93 = arith.constant 0 : i32
    %c0_i32_94 = arith.constant 0 : i32
    %169 = tpu.memref_slice %arg3[%c0_i32_91, %c0_i32_92, %c0_i32_93, %c0_i32_94] : memref<1x13x8x128xf32, #tpu.memory_space<vmem>> -> memref<1x13x8x128xf32, #tpu.memory_space<vmem>>
    %170 = tpu.memref_squeeze %169 : memref<1x13x8x128xf32, #tpu.memory_space<vmem>> -> memref<13x8x128xf32, #tpu.memory_space<vmem>>
    %c5_95 = arith.constant 5 : index
    %171 = arith.index_cast %17 : i32 to index
    %c0_96 = arith.constant 0 : index
    %172 = vector.load %170[%c5_95, %171, %c0_96] : memref<13x8x128xf32, #tpu.memory_space<vmem>>, vector<1x8x128xf32>
    %173 = vector.shape_cast %172 : vector<1x8x128xf32> to vector<8x128xf32>
    %cst_97 = arith.constant 0.000000e+00 : f32
    %174 = vector.broadcast %cst_97 : f32 to vector<8x128xf32>
    %175 = arith.cmpf oeq, %168, %174 : vector<8x128xf32>
    %cst_98 = arith.constant 0.000000e+00 : f32
    %176 = vector.broadcast %cst_98 : f32 to vector<8x128xf32>
    %177 = arith.select %175, %173, %176 : vector<8x128xi1>, vector<8x128xf32>
    %c0_i32_99 = arith.constant 0 : i32
    %c0_i32_100 = arith.constant 0 : i32
    %c0_i32_101 = arith.constant 0 : i32
    %c0_i32_102 = arith.constant 0 : i32
    %178 = tpu.memref_slice %arg3[%c0_i32_99, %c0_i32_100, %c0_i32_101, %c0_i32_102] : memref<1x13x8x128xf32, #tpu.memory_space<vmem>> -> memref<1x13x8x128xf32, #tpu.memory_space<vmem>>
    %179 = tpu.memref_squeeze %178 : memref<1x13x8x128xf32, #tpu.memory_space<vmem>> -> memref<13x8x128xf32, #tpu.memory_space<vmem>>
    %c6 = arith.constant 6 : index
    %180 = arith.index_cast %17 : i32 to index
    %c0_103 = arith.constant 0 : index
    %181 = vector.load %179[%c6, %180, %c0_103] : memref<13x8x128xf32, #tpu.memory_space<vmem>>, vector<1x8x128xf32>
    %182 = vector.shape_cast %181 : vector<1x8x128xf32> to vector<8x128xf32>
    %183 = arith.maximumf %173, %182 : vector<8x128xf32>
    %cst_104 = arith.constant 1.000000e+00 : f32
    %184 = vector.broadcast %cst_104 : f32 to vector<8x128xf32>
    %185 = arith.cmpf oeq, %168, %184 : vector<8x128xf32>
    %cst_105 = arith.constant 0.000000e+00 : f32
    %186 = vector.broadcast %cst_105 : f32 to vector<8x128xf32>
    %187 = arith.select %185, %182, %186 : vector<8x128xi1>, vector<8x128xf32>
    %188 = arith.addf %177, %187 : vector<8x128xf32>
    %c0_i32_106 = arith.constant 0 : i32
    %c0_i32_107 = arith.constant 0 : i32
    %c0_i32_108 = arith.constant 0 : i32
    %c0_i32_109 = arith.constant 0 : i32
    %189 = tpu.memref_slice %arg3[%c0_i32_106, %c0_i32_107, %c0_i32_108, %c0_i32_109] : memref<1x13x8x128xf32, #tpu.memory_space<vmem>> -> memref<1x13x8x128xf32, #tpu.memory_space<vmem>>
    %190 = tpu.memref_squeeze %189 : memref<1x13x8x128xf32, #tpu.memory_space<vmem>> -> memref<13x8x128xf32, #tpu.memory_space<vmem>>
    %c7 = arith.constant 7 : index
    %191 = arith.index_cast %17 : i32 to index
    %c0_110 = arith.constant 0 : index
    %192 = vector.load %190[%c7, %191, %c0_110] : memref<13x8x128xf32, #tpu.memory_space<vmem>>, vector<1x8x128xf32>
    %193 = vector.shape_cast %192 : vector<1x8x128xf32> to vector<8x128xf32>
    %194 = arith.maximumf %183, %193 : vector<8x128xf32>
    %cst_111 = arith.constant 2.000000e+00 : f32
    %195 = vector.broadcast %cst_111 : f32 to vector<8x128xf32>
    %196 = arith.cmpf oeq, %168, %195 : vector<8x128xf32>
    %cst_112 = arith.constant 0.000000e+00 : f32
    %197 = vector.broadcast %cst_112 : f32 to vector<8x128xf32>
    %198 = arith.select %196, %193, %197 : vector<8x128xi1>, vector<8x128xf32>
    %199 = arith.addf %188, %198 : vector<8x128xf32>
    %c0_i32_113 = arith.constant 0 : i32
    %c0_i32_114 = arith.constant 0 : i32
    %c0_i32_115 = arith.constant 0 : i32
    %c0_i32_116 = arith.constant 0 : i32
    %200 = tpu.memref_slice %arg3[%c0_i32_113, %c0_i32_114, %c0_i32_115, %c0_i32_116] : memref<1x13x8x128xf32, #tpu.memory_space<vmem>> -> memref<1x13x8x128xf32, #tpu.memory_space<vmem>>
    %201 = tpu.memref_squeeze %200 : memref<1x13x8x128xf32, #tpu.memory_space<vmem>> -> memref<13x8x128xf32, #tpu.memory_space<vmem>>
    %c8 = arith.constant 8 : index
    %202 = arith.index_cast %17 : i32 to index
    %c0_117 = arith.constant 0 : index
    %203 = vector.load %201[%c8, %202, %c0_117] : memref<13x8x128xf32, #tpu.memory_space<vmem>>, vector<1x8x128xf32>
    %204 = vector.shape_cast %203 : vector<1x8x128xf32> to vector<8x128xf32>
    %205 = arith.maximumf %194, %204 : vector<8x128xf32>
    %cst_118 = arith.constant 3.000000e+00 : f32
    %206 = vector.broadcast %cst_118 : f32 to vector<8x128xf32>
    %207 = arith.cmpf oeq, %168, %206 : vector<8x128xf32>
    %cst_119 = arith.constant 0.000000e+00 : f32
    %208 = vector.broadcast %cst_119 : f32 to vector<8x128xf32>
    %209 = arith.select %207, %204, %208 : vector<8x128xi1>, vector<8x128xf32>
    %210 = arith.addf %199, %209 : vector<8x128xf32>
    %c0_i32_120 = arith.constant 0 : i32
    %c0_i32_121 = arith.constant 0 : i32
    %c0_i32_122 = arith.constant 0 : i32
    %c0_i32_123 = arith.constant 0 : i32
    %211 = tpu.memref_slice %arg3[%c0_i32_120, %c0_i32_121, %c0_i32_122, %c0_i32_123] : memref<1x13x8x128xf32, #tpu.memory_space<vmem>> -> memref<1x13x8x128xf32, #tpu.memory_space<vmem>>
    %212 = tpu.memref_squeeze %211 : memref<1x13x8x128xf32, #tpu.memory_space<vmem>> -> memref<13x8x128xf32, #tpu.memory_space<vmem>>
    %c9 = arith.constant 9 : index
    %213 = arith.index_cast %17 : i32 to index
    %c0_124 = arith.constant 0 : index
    %214 = vector.load %212[%c9, %213, %c0_124] : memref<13x8x128xf32, #tpu.memory_space<vmem>>, vector<1x8x128xf32>
    %215 = vector.shape_cast %214 : vector<1x8x128xf32> to vector<8x128xf32>
    %216 = arith.maximumf %205, %215 : vector<8x128xf32>
    %cst_125 = arith.constant 4.000000e+00 : f32
    %217 = vector.broadcast %cst_125 : f32 to vector<8x128xf32>
    %218 = arith.cmpf oeq, %168, %217 : vector<8x128xf32>
    %cst_126 = arith.constant 0.000000e+00 : f32
    %219 = vector.broadcast %cst_126 : f32 to vector<8x128xf32>
    %220 = arith.select %218, %215, %219 : vector<8x128xi1>, vector<8x128xf32>
    %221 = arith.addf %210, %220 : vector<8x128xf32>
    %c0_i32_127 = arith.constant 0 : i32
    %c0_i32_128 = arith.constant 0 : i32
    %c0_i32_129 = arith.constant 0 : i32
    %c0_i32_130 = arith.constant 0 : i32
    %222 = tpu.memref_slice %arg3[%c0_i32_127, %c0_i32_128, %c0_i32_129, %c0_i32_130] : memref<1x13x8x128xf32, #tpu.memory_space<vmem>> -> memref<1x13x8x128xf32, #tpu.memory_space<vmem>>
    %223 = tpu.memref_squeeze %222 : memref<1x13x8x128xf32, #tpu.memory_space<vmem>> -> memref<13x8x128xf32, #tpu.memory_space<vmem>>
    %c10 = arith.constant 10 : index
    %224 = arith.index_cast %17 : i32 to index
    %c0_131 = arith.constant 0 : index
    %225 = vector.load %223[%c10, %224, %c0_131] : memref<13x8x128xf32, #tpu.memory_space<vmem>>, vector<1x8x128xf32>
    %226 = vector.shape_cast %225 : vector<1x8x128xf32> to vector<8x128xf32>
    %227 = arith.maximumf %216, %226 : vector<8x128xf32>
    %cst_132 = arith.constant 5.000000e+00 : f32
    %228 = vector.broadcast %cst_132 : f32 to vector<8x128xf32>
    %229 = arith.cmpf oeq, %168, %228 : vector<8x128xf32>
    %cst_133 = arith.constant 0.000000e+00 : f32
    %230 = vector.broadcast %cst_133 : f32 to vector<8x128xf32>
    %231 = arith.select %229, %226, %230 : vector<8x128xi1>, vector<8x128xf32>
    %232 = arith.addf %221, %231 : vector<8x128xf32>
    %c0_i32_134 = arith.constant 0 : i32
    %c0_i32_135 = arith.constant 0 : i32
    %c0_i32_136 = arith.constant 0 : i32
    %c0_i32_137 = arith.constant 0 : i32
    %233 = tpu.memref_slice %arg3[%c0_i32_134, %c0_i32_135, %c0_i32_136, %c0_i32_137] : memref<1x13x8x128xf32, #tpu.memory_space<vmem>> -> memref<1x13x8x128xf32, #tpu.memory_space<vmem>>
    %234 = tpu.memref_squeeze %233 : memref<1x13x8x128xf32, #tpu.memory_space<vmem>> -> memref<13x8x128xf32, #tpu.memory_space<vmem>>
    %c11 = arith.constant 11 : index
    %235 = arith.index_cast %17 : i32 to index
    %c0_138 = arith.constant 0 : index
    %236 = vector.load %234[%c11, %235, %c0_138] : memref<13x8x128xf32, #tpu.memory_space<vmem>>, vector<1x8x128xf32>
    %237 = vector.shape_cast %236 : vector<1x8x128xf32> to vector<8x128xf32>
    %238 = arith.maximumf %227, %237 : vector<8x128xf32>
    %cst_139 = arith.constant 6.000000e+00 : f32
    %239 = vector.broadcast %cst_139 : f32 to vector<8x128xf32>
    %240 = arith.cmpf oeq, %168, %239 : vector<8x128xf32>
    %cst_140 = arith.constant 0.000000e+00 : f32
    %241 = vector.broadcast %cst_140 : f32 to vector<8x128xf32>
    %242 = arith.select %240, %237, %241 : vector<8x128xi1>, vector<8x128xf32>
    %243 = arith.addf %232, %242 : vector<8x128xf32>
    %c0_i32_141 = arith.constant 0 : i32
    %c0_i32_142 = arith.constant 0 : i32
    %c0_i32_143 = arith.constant 0 : i32
    %c0_i32_144 = arith.constant 0 : i32
    %244 = tpu.memref_slice %arg3[%c0_i32_141, %c0_i32_142, %c0_i32_143, %c0_i32_144] : memref<1x13x8x128xf32, #tpu.memory_space<vmem>> -> memref<1x13x8x128xf32, #tpu.memory_space<vmem>>
    %245 = tpu.memref_squeeze %244 : memref<1x13x8x128xf32, #tpu.memory_space<vmem>> -> memref<13x8x128xf32, #tpu.memory_space<vmem>>
    %c12 = arith.constant 12 : index
    %246 = arith.index_cast %17 : i32 to index
    %c0_145 = arith.constant 0 : index
    %247 = vector.load %245[%c12, %246, %c0_145] : memref<13x8x128xf32, #tpu.memory_space<vmem>>, vector<1x8x128xf32>
    %248 = vector.shape_cast %247 : vector<1x8x128xf32> to vector<8x128xf32>
    %249 = arith.maximumf %238, %248 : vector<8x128xf32>
    %cst_146 = arith.constant 7.000000e+00 : f32
    %250 = vector.broadcast %cst_146 : f32 to vector<8x128xf32>
    %251 = arith.cmpf oeq, %168, %250 : vector<8x128xf32>
    %cst_147 = arith.constant 0.000000e+00 : f32
    %252 = vector.broadcast %cst_147 : f32 to vector<8x128xf32>
    %253 = arith.select %251, %248, %252 : vector<8x128xi1>, vector<8x128xf32>
    %254 = arith.addf %243, %253 : vector<8x128xf32>
    %cst_148 = arith.constant 0.000000e+00 : f32
    %255 = vector.broadcast %cst_148 : f32 to vector<8x128xf32>
    %c0_i32_149 = arith.constant 0 : i32
    %c0_i32_150 = arith.constant 0 : i32
    %c0_i32_151 = arith.constant 0 : i32
    %c0_i32_152 = arith.constant 0 : i32
    %256 = tpu.memref_slice %arg3[%c0_i32_149, %c0_i32_150, %c0_i32_151, %c0_i32_152] : memref<1x13x8x128xf32, #tpu.memory_space<vmem>> -> memref<1x13x8x128xf32, #tpu.memory_space<vmem>>
    %257 = tpu.memref_squeeze %256 : memref<1x13x8x128xf32, #tpu.memory_space<vmem>> -> memref<13x8x128xf32, #tpu.memory_space<vmem>>
    %c5_153 = arith.constant 5 : index
    %258 = arith.index_cast %17 : i32 to index
    %c0_154 = arith.constant 0 : index
    %259 = vector.load %257[%c5_153, %258, %c0_154] : memref<13x8x128xf32, #tpu.memory_space<vmem>>, vector<1x8x128xf32>
    %260 = vector.shape_cast %259 : vector<1x8x128xf32> to vector<8x128xf32>
    %261 = arith.subf %260, %249 : vector<8x128xf32>
    %262 = math.exp %261 : vector<8x128xf32>
    %263 = arith.addf %255, %262 : vector<8x128xf32>
    %c0_i32_155 = arith.constant 0 : i32
    %c0_i32_156 = arith.constant 0 : i32
    %c0_i32_157 = arith.constant 0 : i32
    %c0_i32_158 = arith.constant 0 : i32
    %264 = tpu.memref_slice %arg3[%c0_i32_155, %c0_i32_156, %c0_i32_157, %c0_i32_158] : memref<1x13x8x128xf32, #tpu.memory_space<vmem>> -> memref<1x13x8x128xf32, #tpu.memory_space<vmem>>
    %265 = tpu.memref_squeeze %264 : memref<1x13x8x128xf32, #tpu.memory_space<vmem>> -> memref<13x8x128xf32, #tpu.memory_space<vmem>>
    %c6_159 = arith.constant 6 : index
    %266 = arith.index_cast %17 : i32 to index
    %c0_160 = arith.constant 0 : index
    %267 = vector.load %265[%c6_159, %266, %c0_160] : memref<13x8x128xf32, #tpu.memory_space<vmem>>, vector<1x8x128xf32>
    %268 = vector.shape_cast %267 : vector<1x8x128xf32> to vector<8x128xf32>
    %269 = arith.subf %268, %249 : vector<8x128xf32>
    %270 = math.exp %269 : vector<8x128xf32>
    %271 = arith.addf %263, %270 : vector<8x128xf32>
    %c0_i32_161 = arith.constant 0 : i32
    %c0_i32_162 = arith.constant 0 : i32
    %c0_i32_163 = arith.constant 0 : i32
    %c0_i32_164 = arith.constant 0 : i32
    %272 = tpu.memref_slice %arg3[%c0_i32_161, %c0_i32_162, %c0_i32_163, %c0_i32_164] : memref<1x13x8x128xf32, #tpu.memory_space<vmem>> -> memref<1x13x8x128xf32, #tpu.memory_space<vmem>>
    %273 = tpu.memref_squeeze %272 : memref<1x13x8x128xf32, #tpu.memory_space<vmem>> -> memref<13x8x128xf32, #tpu.memory_space<vmem>>
    %c7_165 = arith.constant 7 : index
    %274 = arith.index_cast %17 : i32 to index
    %c0_166 = arith.constant 0 : index
    %275 = vector.load %273[%c7_165, %274, %c0_166] : memref<13x8x128xf32, #tpu.memory_space<vmem>>, vector<1x8x128xf32>
    %276 = vector.shape_cast %275 : vector<1x8x128xf32> to vector<8x128xf32>
    %277 = arith.subf %276, %249 : vector<8x128xf32>
    %278 = math.exp %277 : vector<8x128xf32>
    %279 = arith.addf %271, %278 : vector<8x128xf32>
    %c0_i32_167 = arith.constant 0 : i32
    %c0_i32_168 = arith.constant 0 : i32
    %c0_i32_169 = arith.constant 0 : i32
    %c0_i32_170 = arith.constant 0 : i32
    %280 = tpu.memref_slice %arg3[%c0_i32_167, %c0_i32_168, %c0_i32_169, %c0_i32_170] : memref<1x13x8x128xf32, #tpu.memory_space<vmem>> -> memref<1x13x8x128xf32, #tpu.memory_space<vmem>>
    %281 = tpu.memref_squeeze %280 : memref<1x13x8x128xf32, #tpu.memory_space<vmem>> -> memref<13x8x128xf32, #tpu.memory_space<vmem>>
    %c8_171 = arith.constant 8 : index
    %282 = arith.index_cast %17 : i32 to index
    %c0_172 = arith.constant 0 : index
    %283 = vector.load %281[%c8_171, %282, %c0_172] : memref<13x8x128xf32, #tpu.memory_space<vmem>>, vector<1x8x128xf32>
    %284 = vector.shape_cast %283 : vector<1x8x128xf32> to vector<8x128xf32>
    %285 = arith.subf %284, %249 : vector<8x128xf32>
    %286 = math.exp %285 : vector<8x128xf32>
    %287 = arith.addf %279, %286 : vector<8x128xf32>
    %c0_i32_173 = arith.constant 0 : i32
    %c0_i32_174 = arith.constant 0 : i32
    %c0_i32_175 = arith.constant 0 : i32
    %c0_i32_176 = arith.constant 0 : i32
    %288 = tpu.memref_slice %arg3[%c0_i32_173, %c0_i32_174, %c0_i32_175, %c0_i32_176] : memref<1x13x8x128xf32, #tpu.memory_space<vmem>> -> memref<1x13x8x128xf32, #tpu.memory_space<vmem>>
    %289 = tpu.memref_squeeze %288 : memref<1x13x8x128xf32, #tpu.memory_space<vmem>> -> memref<13x8x128xf32, #tpu.memory_space<vmem>>
    %c9_177 = arith.constant 9 : index
    %290 = arith.index_cast %17 : i32 to index
    %c0_178 = arith.constant 0 : index
    %291 = vector.load %289[%c9_177, %290, %c0_178] : memref<13x8x128xf32, #tpu.memory_space<vmem>>, vector<1x8x128xf32>
    %292 = vector.shape_cast %291 : vector<1x8x128xf32> to vector<8x128xf32>
    %293 = arith.subf %292, %249 : vector<8x128xf32>
    %294 = math.exp %293 : vector<8x128xf32>
    %295 = arith.addf %287, %294 : vector<8x128xf32>
    %c0_i32_179 = arith.constant 0 : i32
    %c0_i32_180 = arith.constant 0 : i32
    %c0_i32_181 = arith.constant 0 : i32
    %c0_i32_182 = arith.constant 0 : i32
    %296 = tpu.memref_slice %arg3[%c0_i32_179, %c0_i32_180, %c0_i32_181, %c0_i32_182] : memref<1x13x8x128xf32, #tpu.memory_space<vmem>> -> memref<1x13x8x128xf32, #tpu.memory_space<vmem>>
    %297 = tpu.memref_squeeze %296 : memref<1x13x8x128xf32, #tpu.memory_space<vmem>> -> memref<13x8x128xf32, #tpu.memory_space<vmem>>
    %c10_183 = arith.constant 10 : index
    %298 = arith.index_cast %17 : i32 to index
    %c0_184 = arith.constant 0 : index
    %299 = vector.load %297[%c10_183, %298, %c0_184] : memref<13x8x128xf32, #tpu.memory_space<vmem>>, vector<1x8x128xf32>
    %300 = vector.shape_cast %299 : vector<1x8x128xf32> to vector<8x128xf32>
    %301 = arith.subf %300, %249 : vector<8x128xf32>
    %302 = math.exp %301 : vector<8x128xf32>
    %303 = arith.addf %295, %302 : vector<8x128xf32>
    %c0_i32_185 = arith.constant 0 : i32
    %c0_i32_186 = arith.constant 0 : i32
    %c0_i32_187 = arith.constant 0 : i32
    %c0_i32_188 = arith.constant 0 : i32
    %304 = tpu.memref_slice %arg3[%c0_i32_185, %c0_i32_186, %c0_i32_187, %c0_i32_188] : memref<1x13x8x128xf32, #tpu.memory_space<vmem>> -> memref<1x13x8x128xf32, #tpu.memory_space<vmem>>
    %305 = tpu.memref_squeeze %304 : memref<1x13x8x128xf32, #tpu.memory_space<vmem>> -> memref<13x8x128xf32, #tpu.memory_space<vmem>>
    %c11_189 = arith.constant 11 : index
    %306 = arith.index_cast %17 : i32 to index
    %c0_190 = arith.constant 0 : index
    %307 = vector.load %305[%c11_189, %306, %c0_190] : memref<13x8x128xf32, #tpu.memory_space<vmem>>, vector<1x8x128xf32>
    %308 = vector.shape_cast %307 : vector<1x8x128xf32> to vector<8x128xf32>
    %309 = arith.subf %308, %249 : vector<8x128xf32>
    %310 = math.exp %309 : vector<8x128xf32>
    %311 = arith.addf %303, %310 : vector<8x128xf32>
    %c0_i32_191 = arith.constant 0 : i32
    %c0_i32_192 = arith.constant 0 : i32
    %c0_i32_193 = arith.constant 0 : i32
    %c0_i32_194 = arith.constant 0 : i32
    %312 = tpu.memref_slice %arg3[%c0_i32_191, %c0_i32_192, %c0_i32_193, %c0_i32_194] : memref<1x13x8x128xf32, #tpu.memory_space<vmem>> -> memref<1x13x8x128xf32, #tpu.memory_space<vmem>>
    %313 = tpu.memref_squeeze %312 : memref<1x13x8x128xf32, #tpu.memory_space<vmem>> -> memref<13x8x128xf32, #tpu.memory_space<vmem>>
    %c12_195 = arith.constant 12 : index
    %314 = arith.index_cast %17 : i32 to index
    %c0_196 = arith.constant 0 : index
    %315 = vector.load %313[%c12_195, %314, %c0_196] : memref<13x8x128xf32, #tpu.memory_space<vmem>>, vector<1x8x128xf32>
    %316 = vector.shape_cast %315 : vector<1x8x128xf32> to vector<8x128xf32>
    %317 = arith.subf %316, %249 : vector<8x128xf32>
    %318 = math.exp %317 : vector<8x128xf32>
    %319 = arith.addf %311, %318 : vector<8x128xf32>
    %320 = math.log %319 : vector<8x128xf32>
    %321 = arith.addf %249, %320 : vector<8x128xf32>
    %322 = arith.subf %321, %254 : vector<8x128xf32>
    %cst_197 = arith.constant 0.000000e+00 : f32
    %323 = vector.broadcast %cst_197 : f32 to vector<8x128xf32>
    %324 = arith.select %26, %41, %323 : vector<8x128xi1>, vector<8x128xf32>
    %325 = arith.addf %11, %324 : vector<8x128xf32>
    %326 = arith.extui %26 : vector<8x128xi1> to vector<8x128xi32>
    %327 = arith.sitofp %326 : vector<8x128xi32> to vector<8x128xf32>
    %328 = arith.addf %12, %327 : vector<8x128xf32>
    %cst_198 = arith.constant 0.000000e+00 : f32
    %329 = vector.broadcast %cst_198 : f32 to vector<8x128xf32>
    %330 = arith.select %24, %142, %329 : vector<8x128xi1>, vector<8x128xf32>
    %331 = arith.addf %13, %330 : vector<8x128xf32>
    %332 = arith.extui %24 : vector<8x128xi1> to vector<8x128xi32>
    %333 = arith.sitofp %332 : vector<8x128xi32> to vector<8x128xf32>
    %334 = arith.addf %14, %333 : vector<8x128xf32>
    %cst_199 = arith.constant 0.000000e+00 : f32
    %335 = vector.broadcast %cst_199 : f32 to vector<8x128xf32>
    %336 = arith.select %24, %163, %335 : vector<8x128xi1>, vector<8x128xf32>
    %337 = arith.addf %15, %336 : vector<8x128xf32>
    %cst_200 = arith.constant 0.000000e+00 : f32
    %338 = vector.broadcast %cst_200 : f32 to vector<8x128xf32>
    %339 = arith.select %24, %322, %338 : vector<8x128xi1>, vector<8x128xf32>
    %340 = arith.addf %16, %339 : vector<8x128xf32>
    %c0_201 = arith.constant 0 : index
    %c0_202 = arith.constant 0 : index
    %c0_203 = arith.constant 0 : index
    %c0_204 = arith.constant 0 : index
    %341 = vector.load %arg6[%c0_201, %c0_202, %c0_203, %c0_204] : memref<1x6x8x128xf32, #tpu.memory_space<vmem>>, vector<1x1x8x128xf32>
    %342 = vector.shape_cast %341 : vector<1x1x8x128xf32> to vector<8x128xf32>
    %343 = arith.addf %342, %325 : vector<8x128xf32>
    %c0_205 = arith.constant 0 : index
    %c0_206 = arith.constant 0 : index
    %c0_207 = arith.constant 0 : index
    %c0_208 = arith.constant 0 : index
    %344 = vector.load %arg6[%c0_205, %c0_206, %c0_207, %c0_208] : memref<1x6x8x128xf32, #tpu.memory_space<vmem>>, vector<1x1x8x128xf32>
    %345 = vector.shape_cast %344 : vector<1x1x8x128xf32> to vector<8x128xf32>
    %346 = vector.shape_cast %343 : vector<8x128xf32> to vector<1x1x8x128xf32>
    tpu.vector_store %arg6[%c0_205, %c0_206, %c0_207, %c0_208], %346 {strides = array<i32>} : memref<1x6x8x128xf32, #tpu.memory_space<vmem>>, vector<1x1x8x128xf32>,
    %c0_209 = arith.constant 0 : index
    %c1_210 = arith.constant 1 : index
    %c0_211 = arith.constant 0 : index
    %c0_212 = arith.constant 0 : index
    %347 = vector.load %arg6[%c0_209, %c1_210, %c0_211, %c0_212] : memref<1x6x8x128xf32, #tpu.memory_space<vmem>>, vector<1x1x8x128xf32>
    %348 = vector.shape_cast %347 : vector<1x1x8x128xf32> to vector<8x128xf32>
    %349 = arith.addf %348, %328 : vector<8x128xf32>
    %c0_213 = arith.constant 0 : index
    %c1_214 = arith.constant 1 : index
    %c0_215 = arith.constant 0 : index
    %c0_216 = arith.constant 0 : index
    %350 = vector.load %arg6[%c0_213, %c1_214, %c0_215, %c0_216] : memref<1x6x8x128xf32, #tpu.memory_space<vmem>>, vector<1x1x8x128xf32>
    %351 = vector.shape_cast %350 : vector<1x1x8x128xf32> to vector<8x128xf32>
    %352 = vector.shape_cast %349 : vector<8x128xf32> to vector<1x1x8x128xf32>
    tpu.vector_store %arg6[%c0_213, %c1_214, %c0_215, %c0_216], %352 {strides = array<i32>} : memref<1x6x8x128xf32, #tpu.memory_space<vmem>>, vector<1x1x8x128xf32>,
    %c0_217 = arith.constant 0 : index
    %c2_218 = arith.constant 2 : index
    %c0_219 = arith.constant 0 : index
    %c0_220 = arith.constant 0 : index
    %353 = vector.load %arg6[%c0_217, %c2_218, %c0_219, %c0_220] : memref<1x6x8x128xf32, #tpu.memory_space<vmem>>, vector<1x1x8x128xf32>
    %354 = vector.shape_cast %353 : vector<1x1x8x128xf32> to vector<8x128xf32>
    %355 = arith.addf %354, %331 : vector<8x128xf32>
    %c0_221 = arith.constant 0 : index
    %c2_222 = arith.constant 2 : index
    %c0_223 = arith.constant 0 : index
    %c0_224 = arith.constant 0 : index
    %356 = vector.load %arg6[%c0_221, %c2_222, %c0_223, %c0_224] : memref<1x6x8x128xf32, #tpu.memory_space<vmem>>, vector<1x1x8x128xf32>
    %357 = vector.shape_cast %356 : vector<1x1x8x128xf32> to vector<8x128xf32>
    %358 = vector.shape_cast %355 : vector<8x128xf32> to vector<1x1x8x128xf32>
    tpu.vector_store %arg6[%c0_221, %c2_222, %c0_223, %c0_224], %358 {strides = array<i32>} : memref<1x6x8x128xf32, #tpu.memory_space<vmem>>, vector<1x1x8x128xf32>,
    %c0_225 = arith.constant 0 : index
    %c3_226 = arith.constant 3 : index
    %c0_227 = arith.constant 0 : index
    %c0_228 = arith.constant 0 : index
    %359 = vector.load %arg6[%c0_225, %c3_226, %c0_227, %c0_228] : memref<1x6x8x128xf32, #tpu.memory_space<vmem>>, vector<1x1x8x128xf32>
    %360 = vector.shape_cast %359 : vector<1x1x8x128xf32> to vector<8x128xf32>
    %361 = arith.addf %360, %334 : vector<8x128xf32>
    %c0_229 = arith.constant 0 : index
    %c3_230 = arith.constant 3 : index
    %c0_231 = arith.constant 0 : index
    %c0_232 = arith.constant 0 : index
    %362 = vector.load %arg6[%c0_229, %c3_230, %c0_231, %c0_232] : memref<1x6x8x128xf32, #tpu.memory_space<vmem>>, vector<1x1x8x128xf32>
    %363 = vector.shape_cast %362 : vector<1x1x8x128xf32> to vector<8x128xf32>
    %364 = vector.shape_cast %361 : vector<8x128xf32> to vector<1x1x8x128xf32>
    tpu.vector_store %arg6[%c0_229, %c3_230, %c0_231, %c0_232], %364 {strides = array<i32>} : memref<1x6x8x128xf32, #tpu.memory_space<vmem>>, vector<1x1x8x128xf32>,
    %c0_233 = arith.constant 0 : index
    %c4_234 = arith.constant 4 : index
    %c0_235 = arith.constant 0 : index
    %c0_236 = arith.constant 0 : index
    %365 = vector.load %arg6[%c0_233, %c4_234, %c0_235, %c0_236] : memref<1x6x8x128xf32, #tpu.memory_space<vmem>>, vector<1x1x8x128xf32>
    %366 = vector.shape_cast %365 : vector<1x1x8x128xf32> to vector<8x128xf32>
    %367 = arith.addf %366, %337 : vector<8x128xf32>
    %c0_237 = arith.constant 0 : index
    %c4_238 = arith.constant 4 : index
    %c0_239 = arith.constant 0 : index
    %c0_240 = arith.constant 0 : index
    %368 = vector.load %arg6[%c0_237, %c4_238, %c0_239, %c0_240] : memref<1x6x8x128xf32, #tpu.memory_space<vmem>>, vector<1x1x8x128xf32>
    %369 = vector.shape_cast %368 : vector<1x1x8x128xf32> to vector<8x128xf32>
    %370 = vector.shape_cast %367 : vector<8x128xf32> to vector<1x1x8x128xf32>
    tpu.vector_store %arg6[%c0_237, %c4_238, %c0_239, %c0_240], %370 {strides = array<i32>} : memref<1x6x8x128xf32, #tpu.memory_space<vmem>>, vector<1x1x8x128xf32>,
    %c0_241 = arith.constant 0 : index
    %c5_242 = arith.constant 5 : index
    %c0_243 = arith.constant 0 : index
    %c0_244 = arith.constant 0 : index
    %371 = vector.load %arg6[%c0_241, %c5_242, %c0_243, %c0_244] : memref<1x6x8x128xf32, #tpu.memory_space<vmem>>, vector<1x1x8x128xf32>
    %372 = vector.shape_cast %371 : vector<1x1x8x128xf32> to vector<8x128xf32>
    %373 = arith.addf %372, %340 : vector<8x128xf32>
    %c0_245 = arith.constant 0 : index
    %c5_246 = arith.constant 5 : index
    %c0_247 = arith.constant 0 : index
    %c0_248 = arith.constant 0 : index
    %374 = vector.load %arg6[%c0_245, %c5_246, %c0_247, %c0_248] : memref<1x6x8x128xf32, #tpu.memory_space<vmem>>, vector<1x1x8x128xf32>
    %375 = vector.shape_cast %374 : vector<1x1x8x128xf32> to vector<8x128xf32>
    %376 = vector.shape_cast %373 : vector<8x128xf32> to vector<1x1x8x128xf32>
    tpu.vector_store %arg6[%c0_245, %c5_246, %c0_247, %c0_248], %376 {strides = array<i32>} : memref<1x6x8x128xf32, #tpu.memory_space<vmem>>, vector<1x1x8x128xf32>,
    return
  }
  func.func @transform_0(%arg0: i32, %arg1: i32, %arg2: i32) -> (i32, i32, i32, i32) {
    %c1_i32 = arith.constant 1 : i32
    %0 = arith.muli %arg0, %c1_i32 : i32
    %1 = arith.addi %0, %arg2 : i32
    %c0_i32 = arith.constant 0 : i32
    %c0_i32_0 = arith.constant 0 : i32
    %c0_i32_1 = arith.constant 0 : i32
    return %arg1, %c0_i32, %1, %c0_i32_0 : i32, i32, i32, i32
  }
  func.func @transform_1(%arg0: i32, %arg1: i32, %arg2: i32) -> (i32, i32, i32, i32) {
    %c1_i32 = arith.constant 1 : i32
    %0 = arith.muli %arg0, %c1_i32 : i32
    %1 = arith.addi %0, %arg2 : i32
    %c0_i32 = arith.constant 0 : i32
    %c0_i32_0 = arith.constant 0 : i32
    %c0_i32_1 = arith.constant 0 : i32
    return %arg1, %c0_i32, %1, %c0_i32_0 : i32, i32, i32, i32
  }
  func.func @transform_2(%arg0: i32, %arg1: i32, %arg2: i32) -> (i32, i32) {
    %c0_i32 = arith.constant 0 : i32
    %c0_i32_0 = arith.constant 0 : i32
    %c0_i32_1 = arith.constant 0 : i32
    return %c0_i32, %c0_i32_0 : i32, i32
  }
  func.func @transform_3(%arg0: i32, %arg1: i32, %arg2: i32) -> (i32, i32, i32, i32) {
    %c0_i32 = arith.constant 0 : i32
    %c0_i32_0 = arith.constant 0 : i32
    %c0_i32_1 = arith.constant 0 : i32
    %c0_i32_2 = arith.constant 0 : i32
    return %arg0, %c0_i32, %c0_i32_0, %c0_i32_1 : i32, i32, i32, i32
  }
}

</mosaic_0001>

<bundles_post_ra>
// kernel: yolo_loss_pallas.1
= control target key start
LH: loop header
LB: loop body
LE: loop exit
PB: predicated region body
PF: predicated region fallthrough
CT: control target
= control target key end

     0   :  { %8 = vsyncpa [#allocation5], 0  ;;  %s1036_s12 = smov 0   ;;  %s1038_s13 = smov 0   ;;  %s1325_s0 = inlined_call_operand.vmem [shape: f32[3,13,16,128], index: 0, kind: input, shape index: {}]   ;;  %s1326_s1 = inlined_call_operand.vmem [shape: f32[3,6,16,128], index: 1, kind: input, shape index: {}]   ;;  %s1327_s2 = inlined_call_operand.vmem [shape: f32[3,2], index: 2, kind: input, shape index: {}]   ;;  %s1328_s3 = inlined_call_operand.vmem [shape: f32[2,6,8,128], index: 3, kind: output, shape index: {}]  }
   0x1   :  { %s1040_s14 = smov 0   ;;  %s1042_s15 = smov 0  }
   0x2   :  { %s1044_s16 = smov 0   ;;  %s1046_s17 = smov 0  }
   0x3   :  { %s1048_s18 = smov 0  }
   0x4 LB: > { %s766_s19 = sadd.s32 4294967295, %s1011_s18   ;;  %s29_s20 = sadd.s32 1, %s1003_s16  ;;  %s1011_s18 = sphi %s1048_s18, %s14_s18   ;;  %s1007_s17 = sphi %s1046_s17, %s1339_s17   ;;  %s1003_s16 = sphi %s1044_s16, %s1338_s16   ;;  %s999_s15 = sphi %s1042_s15, %s1337_s15   ;;  %s995_s14 = sphi %s1040_s14, %s1336_s14   ;;  %s991_s13 = sphi %s1038_s13, %s1335_s13   ;;  %s987_s12 = sphi %s1036_s12, %s1334_s12  }
   0x5   : > { %p31_p0 = scmp.ge.s32.totalorder %s29_s20, 3  ;;  %s33_s21 = sadd.s32 1, %s1007_s17 }
   0x6   : > { %s44_s22 = sadd.s32 1, %s991_s13  ;;  %p51_p1 = scmp.ne.s32.totalorder %s991_s13, %s987_s12 }
   0x7   : > { %s1341_s20 = smov (%p31_p0, %s29_s20), 0  ;;  %s1343_s21 = smov (!%p31_p0, %s33_s21), %s1007_s17 }
   0x8   : > { %s39_s23 = ssub.s32 %s1003_s16, %s1341_s20  ;;  %p52_p2 = scmp.eq.s32.totalorder %s1011_s18, 0 }
   0x9   : > { %p35_p3 = scmp.ge.s32.totalorder %s1343_s21, 2  ;;  %p768_p4 = scmp.ge.s32.totalorder %s1011_s18, 1 }
   0xa   : > { %p1084_p5 = por %p52_p2, %p51_p1  ;;  %p145_p6 = scmp.lt.s32.totalorder %s1011_s18, 7 }
   0xb   : > { %s1345_s21 = smov (%p35_p3, %s1343_s21), 0  ;;  %p1097_p8 = scmp.eq.s32.totalorder %s766_s19, 0 }
   0xc   : > { %p1091_p7 = pnand %p768_p4, %p145_p6  ;;  %s40_s26 = ssub.s32 %s1007_s17, %s1345_s21 }
   0xd   : > { %s41_s28 = sor.u32 %s40_s26, %s39_s23  ;;  %s158_s4 = sshll.u32 %s1327_s2, 4  ;;  %s159_s4 = int_to_ptr.vmem [resolvable:$true] %s158_s4 }
   0xe   : > { %s1331_s25 = scalar_select %p1091_p7, 1, 0 }
   0xf   : > { %p827_p9 = pneg %p1091_p7  ;;  %p42_p10 = scmp.eq.s32.totalorder %s41_s28, 0 }
  0x10   : > { %s938_s6 = scalar_lea.vmem %s159_s4, 64  ;;  %p946_p2 = scmp.lt.s32.totalorder %s159_s4, %s159_s4 }
  0x11   : > { %p828_p11 = pnand %p1097_p8, %p827_p9  ;;  %p939_p12 = scmp.ne.s32.totalorder %s159_s4, %s938_s6 }
  0x12   : > { %s1109_s5 = scalar_select %p42_p10, %s991_s13, %s44_s22  }
  0x13   : > { %p940_p13 = pneg %p828_p11  ;;  %p947_p3 = scmp.lt.s32.totalorder %s938_s6, %s938_s6 }
  0x15   : > { %p941_p0 = pnand %p940_p13, %p939_p12  ;;  %p948_p4 = por %p947_p3, %p946_p2 }
  0x17   : > { %p942_p1 = pneg %p941_p0 }
  0x19   : > { %p949_p6 = pnand %p948_p4, %p942_p1 }
  0x1b   : > { %952 = shalt.err (!%p949_p6)
}
  0x1c   : > { %s1013_s7 = smov [#allocation4]   ;;  %p770_p7 = scmp.ge.s32.totalorder %s1011_s18, 6 }
  0x1d   : > { %830 = dma.vmem_to_smem (!%p828_p11), %s159_s4, 64, %s1013_s7, [#allocation5]  }
  0x1e   : > { %165 = sbr.rel (%p770_p7) target bundleno = 61 (0x3d), region = 20 }
  0x25   : > { %168 = sbr.rel (!%p1084_p5) target bundleno = 51 (0x33), region = 24  ;;  %s170_s8 = sand.u32 (%p1084_p5), 1, %s991_s13  }
  0x26   : > { %s813_s9 = smul.u32 (%p1084_p5), 26, %s1003_s16 }
  0x27   : > { %s812_s10 = smul.u32 (%p1084_p5), 104, %s170_s8 }
  0x28   : > { %s175_s11 = sadd.s32 (%p1084_p5), %s1007_s17, %s813_s9 }
  0x29   : > { %s771_s19 = sshll.u32 (%p1084_p5), %s175_s11, 3  ;;  %s172_s28 = scalar_lea.vmem (%p1084_p5), [#allocation2], %s812_s10 }
  0x2a   : > { %s177_s26 = scalar_lea.vmem (%p1084_p5), %s1325_s0, %s771_s19 }
  0x2b   : > { %v229_v0 = vld [vmem:[%s177_s26] sm:$0xff] (%p1084_p5)  ;;  %v231_v1 = vld [vmem:[%s177_s26 + $0x10] sm:$0xff] (%p1084_p5) }
  0x2c   : > { %v233_v2 = vld [vmem:[%s177_s26 + $0x20] sm:$0xff]  ;;  %230 = vst [vmem:[%s172_s28] sm:$0xff] %v229_v0  ;;  %232 = vst [vmem:[%s172_s28 + $0x8] sm:$0xff] %v231_v1  ;;  %v235_v3 = vld [vmem:[%s177_s26 + $0x30] sm:$0xff] }
  0x2d   : > { %234 = vst [vmem:[%s172_s28 + $0x10] sm:$0xff] %v233_v2  ;;  %v237_v4 = vld [vmem:[%s177_s26 + $0x40] sm:$0xff]  ;;  %v239_v5 = vld [vmem:[%s177_s26 + $0x50] sm:$0xff]  ;;  %236 = vst [vmem:[%s172_s28 + $0x18] sm:$0xff] %v235_v3 }
  0x2e   : > { %238 = vst [vmem:[%s172_s28 + $0x20] sm:$0xff] %v237_v4  ;;  %240 = vst [vmem:[%s172_s28 + $0x28] sm:$0xff] %v239_v5  ;;  %v241_v6 = vld [vmem:[%s177_s26 + $0x60] sm:$0xff]  ;;  %v243_v7 = vld [vmem:[%s177_s26 + $0x70] sm:$0xff] }
  0x2f   : > { %v245_v8 = vld [vmem:[%s177_s26 + $0x80] sm:$0xff]  ;;  %242 = vst [vmem:[%s172_s28 + $0x30] sm:$0xff] %v241_v6  ;;  %244 = vst [vmem:[%s172_s28 + $0x38] sm:$0xff] %v243_v7  ;;  %v247_v9 = vld [vmem:[%s177_s26 + $0x90] sm:$0xff] }
  0x30   : > { %246 = vst [vmem:[%s172_s28 + $0x40] sm:$0xff] %v245_v8  ;;  %v249_v10 = vld [vmem:[%s177_s26 + $0xa0] sm:$0xff]  ;;  %v251_v11 = vld [vmem:[%s177_s26 + $0xb0] sm:$0xff]  ;;  %248 = vst [vmem:[%s172_s28 + $0x48] sm:$0xff] %v247_v9 }
  0x31   : > { %250 = vst [vmem:[%s172_s28 + $0x50] sm:$0xff] %v249_v10  ;;  %252 = vst [vmem:[%s172_s28 + $0x58] sm:$0xff] %v251_v11  ;;  %v253_v12 = vld [vmem:[%s177_s26 + $0xc0] sm:$0xff] }
  0x32   : > { %254 = vst [vmem:[%s172_s28 + $0x60] sm:$0xff] %v253_v12 }
  0x33 PF: > { %260 = sbr.rel (!%p1084_p5) target bundleno = 61 (0x3d), region = 62  ;;  %s262_s29 = sand.u32 (%p1084_p5), 1, %s991_s13  }
  0x34   : > { %s815_s30 = smul.u32 (%p1084_p5), 12, %s1003_s16 }
  0x35   : > { %s814_s4 = smul.u32 (%p1084_p5), 48, %s262_s29 }
  0x36   : > { %s267_s6 = sadd.s32 (%p1084_p5), %s1007_s17, %s815_s30 }
  0x37   : > { %s772_s7 = sshll.u32 (%p1084_p5), %s267_s6, 3  ;;  %s264_s11 = scalar_lea.vmem (%p1084_p5), [#allocation3], %s814_s4 }
  0x38   : > { %s269_s10 = scalar_lea.vmem (%p1084_p5), %s1326_s1, %s772_s7 }
  0x39   : > { %v307_v13 = vld [vmem:[%s269_s10] sm:$0xff] (%p1084_p5)  ;;  %v309_v14 = vld [vmem:[%s269_s10 + $0x10] sm:$0xff] (%p1084_p5) }
  0x3a   : > { %v311_v15 = vld [vmem:[%s269_s10 + $0x20] sm:$0xff]  ;;  %308 = vst [vmem:[%s264_s11] sm:$0xff] %v307_v13  ;;  %310 = vst [vmem:[%s264_s11 + $0x8] sm:$0xff] %v309_v14  ;;  %v313_v16 = vld [vmem:[%s269_s10 + $0x30] sm:$0xff] }
  0x3b   : > { %312 = vst [vmem:[%s264_s11 + $0x10] sm:$0xff] %v311_v15  ;;  %v315_v17 = vld [vmem:[%s269_s10 + $0x40] sm:$0xff]  ;;  %v317_v18 = vld [vmem:[%s269_s10 + $0x50] sm:$0xff]  ;;  %314 = vst [vmem:[%s264_s11 + $0x18] sm:$0xff] %v313_v16 }
  0x3c   : > { %316 = vst [vmem:[%s264_s11 + $0x20] sm:$0xff] %v315_v17  ;;  %318 = vst [vmem:[%s264_s11 + $0x28] sm:$0xff] %v317_v18 }
  0x3d PF: > { %p1333_p5 = scmp.ne.s32.totalorder %s1331_s25, 0 }
  0x3e   : > { %s330_s24 = sand.u32 (!%p1333_p5), 1, %s987_s12  }
  0x3f   : > { %327 = sbr.rel (%p1333_p5) target bundleno = 181 (0xb5), region = 100 }
  0x40   : > { %s816_s19 = smul.u32 (!%p1333_p5), 104, %s330_s24 }
  0x41   : > { %s817_s22 = smul.u32 (!%p1333_p5), 48, %s330_s24 }
  0x42   : > { %s1131_s23 = scalar_lea.vmem (!%p1333_p5), [#allocation2], %s816_s19 }
  0x43   : > { %s1133_s26 = scalar_lea.vmem (!%p1333_p5), [#allocation3], %s817_s22 }
  0x46   : > { %982 = dma.done.wait (%p1097_p8), [#allocation5], 64  }
  0x47   : > { %984 = vsyncadd (%p1097_p8), [#allocation5], 4294967232 }
  0x48   : > { %347 = sfence }
  0x49   : > { %p371_p7 = scmp.lt.s32.totalorder %s999_s15, 1  ;;  %p376_p9 = scmp.eq.s32.totalorder %s995_s14, 0 }
  0x4a   : > { %v1014_v19 = vmov (%p376_p9), 0.0  }
  0x4b   : > { %s1347_s15 = smov (!%p371_p7, %s999_s15), 1  ;;  %381 = sbr.rel (!%p376_p9) target bundleno = 82 (0x52), region = 116 }
  0x4c   : > { %s818_s25 = smul.u32 48, %s1347_s15 }
  0x4e   : > { %s1145_s29 = scalar_lea.vmem %s1328_s3, %s818_s25 }
  0x4f   : > { %382 = vst [vmem:[%s1145_s29] sm:$0xff] (%p376_p9), %v1014_v19  ;;  %383 = vst [vmem:[%s1145_s29 + $0x8] sm:$0xff] (%p376_p9), %v1014_v19 }
  0x50   : > { %384 = vst [vmem:[%s1145_s29 + $0x10] sm:$0xff] (%p376_p9), %v1014_v19  ;;  %385 = vst [vmem:[%s1145_s29 + $0x18] sm:$0xff] (%p376_p9), %v1014_v19 }
  0x51   : > { %386 = vst [vmem:[%s1145_s29 + $0x20] sm:$0xff] (%p376_p9), %v1014_v19  ;;  %387 = vst [vmem:[%s1145_s29 + $0x28] sm:$0xff] (%p376_p9), %v1014_v19 }
  0x52 PF: > { %s777_s15 = sshll.u32 %s995_s14, 7  ;;  %v778_v20 = vld [vmem:[%s1131_s23 + $0x8] sm:$0xff]  ;;  %v1156_v21 = vld [vmem:[%s1131_s23 + $0x18] sm:$0xff]  ;;  %v1159_v22 = vld [vmem:[%s1131_s23 + $0x20] sm:$0xff]  ;;  %v1015_v51 = vmov 0.0  }
  0x53   : > { %s1161_s27 = sld [smem:[#allocation4 + %s777_s15]]  ;;  %s390_s30 = sadd.s32 1, %s777_s15  ;;  %v779_v23 = vmul.f32 -1.442695, %v778_v20  ;;  %v440_v24 = vmul.f32 1.442695, %v1156_v21 }
  0x54   : > { %s1164_s4 = sld [smem:[#allocation4 + %s390_s30]]  ;;  %v444_v25 = vmul.f32 1.442695, %v1159_v22  ;;  %v1168_v26 = vld [vmem:[%s1131_s23] sm:$0xff]  ;;  %v780_v27 = vld [vmem:[%s1131_s23 + $0x10] sm:$0xff]  ;;  %v1173_v30 = vld [vmem:[%s1131_s23 + $0x28] sm:$0xff] }
  0x55   : > { %892 = vpow2.f32 %v779_v23  ;;  %v402_v28 = vand.u32 2147483647, %v1168_v26  ;;  %v781_v29 = vmul.f32 -1.442695, %v780_v27  ;;  %v1176_v31 = vld [vmem:[%s1131_s23 + $0x30] sm:$0xff]  ;;  %v1182_v35 = vld [vmem:[%s1131_s23 + $0x38] sm:$0xff] }
  0x56   : > { %894 = vpow2.f32 %v440_v24  ;;  %v518_v34 = vmax.f32 %v1173_v30, %v1176_v31  ;;  %v1186_v38 = vld [vmem:[%s1133_s26] sm:$0xff]  ;;  %v1189_v39 = vld [vmem:[%s1131_s23 + $0x40] sm:$0xff]  ;;  %v1193_v41 = vld [vmem:[%s1131_s23 + $0x48] sm:$0xff]  ;;  %v406_v8 = vmax.f32 %v1168_v26, 0.0  ;;  %vm413_vm8 = vcmp.ge.f32.partialorder %v1168_v26, 0.0 }
  0x57   : > { %896 = vpow2.f32 %v444_v25  ;;  %v403_v32 = vsub.f32 0.0, %v402_v28  ;;  %vm399_vm0 = vcmp.eq.f32.partialorder %v1186_v38, 1.0  ;;  %vm400_vm1 = vcmp.eq.f32.partialorder %v1186_v38, 0.0  ;;  %v1199_v44 = vld [vmem:[%s1131_s23 + $0x50] sm:$0xff]  ;;  %v799_v45 = vld [vmem:[%s1145_s29 + $0x8] sm:$0xff]  ;;  %v1205_v50 = vld [vmem:[%s1131_s23 + $0x58] sm:$0xff] }
  0x58   : > { %898 = vpow2.f32 %v781_v29  ;;  %v525_v40 = vmax.f32 %v518_v34, %v1182_v35  ;;  %v803_v48 = vld [vmem:[%s1145_s29 + $0x18] sm:$0xff]  ;;  %v797_v52 = vsel %vm400_vm1, 1.0, %v1015_v51  ;;  %v798_v53 = vsel %vm399_vm0, 1.0, %v1015_v51  ;;  %v1216_v59 = vld [vmem:[%s1131_s23 + $0x60] sm:$0xff]  ;;  %v1225_v4 = vld [vmem:[%s1133_s26 + $0x20] sm:$0xff] }
  0x59   : > { %v392_v33 = vstv %s1161_s27  ;;  %v404_v37 = vmul.f32 1.442695, %v403_v32  ;;  %v619_v56 = vadd.f32 %v799_v45, %v797_v52  ;;  %v1213_v58 = vld [vmem:[%s1133_s26 + $0x18] sm:$0xff]  ;;  %v627_v60 = vadd.f32 %v803_v48, %v798_v53  ;;  %v784_v7 = vld [vmem:[%s1133_s26 + $0x8] sm:$0xff]  ;;  %v785_v24 = vld [vmem:[%s1133_s26 + $0x10] sm:$0xff] }
  0x5a   : > { %900 = vrcp.f32 %v392_v33  ;;  %v395_v36 = vstv %s1164_s4  ;;  %v532_v42 = vmax.f32 %v525_v40, %v1189_v39  ;;  %v458_v3 = vmul.f32 0.5, %v1213_v58 }
  0x5b   : > { %902 = vrcp.f32 %v395_v36  ;;  %800 = vst [vmem:[%s1145_s29 + $0x8] sm:$0xff] %v619_v56  ;;  %804 = vst [vmem:[%s1145_s29 + $0x18] sm:$0xff] %v627_v60  ;;  %v459_v15 = vmul.f32 0.5, %v1225_v4  ;;  %v478_v25 = vmul.f32 %v1225_v4, %v1213_v58 }
  0x5c   : > { %904 = vpow2.f32 %v404_v37  ;;  %v539_v47 = vmax.f32 %v532_v42, %v1193_v41  ;;  %v461_v17 = vadd.f32 %v784_v7, %v458_v3  ;;  %v464_v23 = vsub.f32 %v784_v7, %v458_v3  ;;  %v1255_v42 = vld [vmem:[%s1133_s26 + $0x28] sm:$0xff] }
  0x5d   : > { %v472_v45 = vsub.f32 %v785_v24, %v459_v15  ;;  %vm513_vm2 = vcmp.eq.f32.partialorder %v1255_v42, 0.0  ;;  %vm519_vm3 = vcmp.eq.f32.partialorder %v1255_v42, 1.0  ;;  %vm526_vm4 = vcmp.eq.f32.partialorder %v1255_v42, 2.0 }
  0x5e   : > { %v546_v55 = vmax.f32 %v539_v47, %v1199_v44  ;;  %vm533_vm5 = vcmp.eq.f32.partialorder %v1255_v42, 3.0  ;;  %vm540_vm6 = vcmp.eq.f32.partialorder %v1255_v42, 4.0  ;;  %vm547_vm7 = vcmp.eq.f32.partialorder %v1255_v42, 5.0 }
  0x5f   : > { %v893_v43 = vpop.eup %892  ;;  %vm554_vm9 = vcmp.eq.f32.partialorder %v1255_v42, 6.0  ;;  %vm561_vm10 = vcmp.eq.f32.partialorder %v1255_v42, 7.0 }
  0x60   : > { %v422_v46 = vadd.f32 1.0, %v893_v43  ;;  %v895_v49 = vpop.eup %894  ;;  %v553_v63 = vmax.f32 %v546_v55, %v1205_v50  ;;  %v469_v43 = vadd.f32 %v785_v24, %v459_v15  ;;  %v562_v26 = vsel %vm561_vm10, %v1216_v59, 0.0 }
  0x61   : > { %v897_v54 = vpop.eup %896  ;;  %v443_v1 = vmul.f32 %v895_v49, %v392_v33 }
  0x62   : > { %906 = vrcp.f32 %v422_v46  ;;  %v899_v57 = vpop.eup %898  ;;  %v1228_v5 = vmax.f32 %v553_v63, %v1216_v59  ;;  %v447_v6 = vmul.f32 %v897_v54, %v395_v36 }
  0x63   : > { %v431_v62 = vadd.f32 1.0, %v899_v57  ;;  %v456_v14 = vmul.f32 0.5, %v443_v1 }
  0x64   : > { %v901_v61 = vpop.eup %900  ;;  %v564_v10 = vsub.f32 %v1173_v30, %v1228_v5  ;;  %v568_v11 = vsub.f32 %v1176_v31, %v1228_v5  ;;  %v572_v12 = vsub.f32 %v1182_v35, %v1228_v5  ;;  %v576_v13 = vsub.f32 %v1189_v39, %v1228_v5 }
  0x65   : > { %v903_v0 = vpop.eup %902  ;;  %819 = vpush %v901_v61  ;;  %908 = vrcp.f32 %v431_v62  ;;  %v580_v16 = vsub.f32 %v1193_v41, %v1228_v5  ;;  %v584_v28 = vsub.f32 %v1199_v44, %v1228_v5  ;;  %v457_v32 = vmul.f32 0.5, %v447_v6 }
  0x66   : > { %v1221_v2 = vpop.eup %904  ;;  %821 = vpush %v903_v0  ;;  %v565_v18 = vmul.f32 1.442695, %v564_v10  ;;  %v569_v19 = vmul.f32 1.442695, %v568_v11  ;;  %v573_v20 = vmul.f32 1.442695, %v572_v12  ;;  %v588_v34 = vsub.f32 %v1205_v50, %v1228_v5 }
  0x67   : > { %v1233_v9 = vadd.f32 1.0, %v1221_v2  ;;  %v577_v27 = vmul.f32 1.442695, %v576_v13  ;;  %v581_v33 = vmul.f32 1.442695, %v580_v16  ;;  %v592_v46 = vsub.f32 %v1216_v59, %v1228_v5  ;;  %v614_v16 = vld [vmem:[%s1145_s29] sm:$0xff] }
  0x68   : > { %v585_v49 = vmul.f32 1.442695, %v584_v28  ;;  %v589_v53 = vmul.f32 1.442695, %v588_v34  ;;  %v477_v60 = vmul.f32 %v447_v6, %v443_v1  ;;  %v479_v61 = vand.u32 2147483647, %v478_v25 }
  0x69   : > { %910 = vlog2.f32 %v1233_v9  ;;  %v593_v62 = vmul.f32 1.442695, %v592_v46  ;;  %v514_v1 = vsel %vm513_vm2, %v1173_v30, 0.0  ;;  %v520_v6 = vsel %vm519_vm3, %v1176_v31, 0.0 }
  0x6a   : > { %912 = vpow2.f32 %v565_v18  ;;  %v521_v30 = vadd.f32 %v520_v6, %v514_v1  ;;  %v527_v28 = vsel %vm526_vm4, %v1182_v35, 0.0 }
  0x6b   : > { %914 = vpow2.f32 %v569_v19  ;;  %v480_v19 = vadd.f32 %v479_v61, %v477_v60 }
  0x6c   : > { %v907_v29 = vpop.eup %906  ;;  %916 = vpow2.f32 %v573_v20 }
  0x6d   : > { %v460_v36 = vadd.f32 %v907_v29, %v456_v14  ;;  %v463_v37 = vsub.f32 %v907_v29, %v456_v14  ;;  %v497_v40 = vsub.f32 %v907_v29, %v784_v7  ;;  %918 = vpow2.f32 %v577_v27 }
  0x6e   : > { %920 = vpow2.f32 %v581_v33 }
  0x6f   : > { %v462_v47 = vmin.f32 %v460_v36, %v461_v17  ;;  %v465_v48 = vmax.f32 %v463_v37, %v464_v23  ;;  %v909_v51 = vpop.eup %908  ;;  %v501_v52 = vmul.f32 %v497_v40, %v497_v40  ;;  %922 = vpow2.f32 %v585_v49 }
  0x70   : > { %v468_v55 = vadd.f32 %v909_v51, %v457_v32  ;;  %v471_v56 = vsub.f32 %v909_v51, %v457_v32  ;;  %v498_v57 = vsub.f32 %v909_v51, %v785_v24  ;;  %924 = vpow2.f32 %v589_v53 }
  0x71   : > { %v466_v54 = vsub.f32 %v462_v47, %v465_v48  ;;  %926 = vpow2.f32 %v593_v62  ;;  %v534_v37 = vsel %vm533_vm5, %v1189_v39, 0.0  ;;  %v541_v48 = vsel %vm540_vm6, %v1193_v41, 0.0  ;;  %v801_v62 = vld [vmem:[%s1145_s29 + $0x10] sm:$0xff] }
  0x72   : > { %v470_v0 = vmin.f32 %v468_v55, %v469_v43  ;;  %v473_v3 = vmax.f32 %v471_v56, %v472_v45  ;;  %v502_v7 = vmul.f32 %v498_v57, %v498_v57  ;;  %928 = vrcp.f32 %v1233_v9 }
  0x73   : > { %v911_v63 = vpop.eup %910  ;;  %v467_v11 = vmax.f32 %v466_v54, 0.0  ;;  %v528_v9 = vadd.f32 %v527_v28, %v521_v30  ;;  %v548_v39 = vsel %vm547_vm7, %v1199_v44, 0.0  ;;  %v555_v57 = vsel %vm554_vm9, %v1205_v50, 0.0 }
  0x74   : > { %v409_v10 = vmul.f32 0.6931472, %v911_v63  ;;  %v474_v12 = vsub.f32 %v470_v0, %v473_v3  ;;  %v1261_v13 = vadd.f32 %v502_v7, %v501_v52  ;;  %v913_v14 = vpop.eup %912 }
  0x75   : > { %v915_v17 = vpop.eup %914  ;;  %v535_v47 = vadd.f32 %v534_v37, %v528_v9 }
  0x76   : > { %v410_v15 = vadd.f32 %v409_v10, %v406_v8  ;;  %v475_v18 = vmax.f32 %v474_v12, 0.0  ;;  %v917_v20 = vpop.eup %916  ;;  %v571_v23 = vadd.f32 %v915_v17, %v913_v14 }
  0x77   : > { %v919_v24 = vpop.eup %918  ;;  %v542_v53 = vadd.f32 %v541_v48, %v535_v47 }
  0x78   : > { %v600_v8 = vsel %vm400_vm1, %v410_v15, 0.0  ;;  %v476_v25 = vmul.f32 %v475_v18, %v467_v11  ;;  %v921_v31 = vpop.eup %920  ;;  %v575_v29 = vadd.f32 %v917_v20, %v571_v23  ;;  %v807_v11 = vld [vmem:[%s1145_s29 + $0x28] sm:$0xff] }
  0x79   : > { %v615_v27 = vadd.f32 %v614_v16, %v600_v8  ;;  %v923_v34 = vpop.eup %922  ;;  %v549_v56 = vadd.f32 %v548_v39, %v542_v53 }
  0x7a   : > { %v481_v32 = vsub.f32 %v480_v19, %v476_v25  ;;  %v579_v33 = vadd.f32 %v919_v24, %v575_v29  ;;  %v925_v43 = vpop.eup %924 }
  0x7b   : > { %616 = vst [vmem:[%s1145_s29] sm:$0xff] %v615_v27  ;;  %v927_v46 = vpop.eup %926  ;;  %v556_v60 = vadd.f32 %v555_v57, %v549_v56 }
  0x7c   : > { %v482_v36 = vadd.f32 1e-06, %v481_v32  ;;  %v583_v40 = vadd.f32 %v921_v31, %v579_v33  ;;  %v929_v35 = vpop.eup %928 }
  0x7d   : > { %v414_v52 = vmul.f32 %v929_v35, %v1221_v2  ;;  %v563_v0 = vadd.f32 %v562_v26, %v556_v60 }
  0x7e   : > { %930 = vrcp.f32 %v482_v36  ;;  %v587_v45 = vadd.f32 %v923_v34, %v583_v40 }
  0x7f   : > { %v415_v55 = vsel %vm413_vm8, %v929_v35, %v414_v52 }
  0x80   : > { %v591_v49 = vadd.f32 %v925_v43, %v587_v45 }
  0x82   : > { %v595_v51 = vadd.f32 %v927_v46, %v591_v49 }
  0x84   : > { %932 = vlog2.f32 %v595_v51 }
  0x88   : > { %v931_v54 = vpop.eup %930 }
  0x89   : > { %v484_v41 = vmul.f32 %v931_v54, %v476_v25  ;;  %v805_v25 = vld [vmem:[%s1145_s29 + $0x20] sm:$0xff] }
  0x8b   : > { %v485_v2 = vsub.f32 %v415_v55, %v484_v41 }
  0x8d   : > { %v486_v61 = vmul.f32 %v485_v2, %v485_v2 }
  0x8e   : > { %v933_v44 = vpop.eup %932 }
  0x8f   : > { %v605_v63 = vsel %vm399_vm0, %v486_v61, 0.0  ;;  %v597_v3 = vmul.f32 0.6931472, %v933_v44 }
  0x90   : > { %v623_v7 = vadd.f32 %v801_v62, %v605_v63 }
  0x91   : > { %v598_v10 = vadd.f32 %v597_v3, %v1228_v5 }
  0x92   : > { %802 = vst [vmem:[%s1145_s29 + $0x10] sm:$0xff] %v623_v7 }
  0x93   : > { %v599_v50 = vsub.f32 %v598_v10, %v563_v0 }
  0x95   : > { %v612_v59 = vsel %vm399_vm0, %v599_v50, 0.0 }
  0x96   : > { %s820_s14 = spop %819  ;;  %v635_v15 = vadd.f32 %v807_v11, %v612_v59 }
  0x97   : > { %v487_v42 = vstv %s820_s14  ;;  %s822_s6 = spop %821 }
  0x98   : > { %v488_v12 = vmul.f32 %v1213_v58, %v487_v42  ;;  %v492_v14 = vstv %s822_s6  ;;  %808 = vst [vmem:[%s1145_s29 + $0x28] sm:$0xff] %v635_v15 }
  0x99   : > { %v493_v1 = vmul.f32 %v1225_v4, %v492_v14 }
  0x9a   : > { %v489_v6 = vadd.f32 1e-06, %v488_v12 }
  0x9b   : > { %v494_v16 = vadd.f32 1e-06, %v493_v1 }
  0x9c   : > { %934 = vlog2.f32 %v489_v6 }
  0x9d   : > { %936 = vlog2.f32 %v494_v16 }
  0xa6   : > { %v935_v5 = vpop.eup %934 }
  0xa7   : > { %v937_v17 = vpop.eup %936  ;;  %v491_v18 = vmul.f32 0.6931472, %v935_v5 }
  0xa8   : > { %v496_v19 = vmul.f32 0.6931472, %v937_v17 }
  0xa9   : > { %v499_v20 = vsub.f32 %v1156_v21, %v491_v18 }
  0xaa   : > { %v500_v23 = vsub.f32 %v1159_v22, %v496_v19 }
  0xab   : > { %v504_v58 = vmul.f32 %v499_v20, %v499_v20 }
  0xac   : > { %v506_v8 = vmul.f32 %v500_v23, %v500_v23 }
  0xad   : > { %v505_v24 = vadd.f32 %v504_v58, %v1261_v13 }
  0xaf   : > { %v507_v4 = vadd.f32 %v506_v8, %v505_v24 }
  0xb1   : > { %v610_v30 = vsel %vm399_vm0, %v507_v4, 0.0 }
  0xb2   : > { %v631_v27 = vadd.f32 %v805_v25, %v610_v30 }
  0xb4   : > { %806 = vst [vmem:[%s1145_s29 + $0x20] sm:$0xff] %v631_v27 }
  0xb5 PF: > { %s14_s18 = sadd.s32 1, %s1011_s18   ;;  %s1334_s12 = smov %s991_s13 }
  0xb6   : > { %p11_p8 = scmp.ge.s32.totalorder %s14_s18, 8   ;;  %s1335_s13 = smov %s1109_s5 }
  0xb7   : > { %s1336_s14 = smov %s1003_s16  ;;  %s1337_s15 = smov %s1007_s17 }
  0xb8   : > { %s1338_s16 = smov %s1341_s20  ;;  %s1339_s17 = smov %s1345_s21 }
  0xb9   :  { %13 = sbr.rel (!%p11_p8) target bundleno = 4 (0x4), region = 182 }
  0xc0   :  { %658 = vsyncpa [#allocation5], 1 }
  0xc1   :  { %660 = vsyncpa [#allocation5 + $0x1], 1 }

</bundles_post_ra>
